<compile_context>
chip_gen: v6e
topology: v6e:2x2x1
jax: 0.10.0
libtpu: 0.0.40
codegen_flags: <defaults>
</compile_context>

<pallas_src>
from functools import partial

import jax
import jax.numpy as jnp
from jax.experimental import pallas as pl
from jax.experimental.pallas import tpu as pltpu


def ngh_kernel(atoms_ref, bonds_ref, gedges_ref, wa_ref, wbr_ref, bias_ref,
               dsel_ref, dsum_ref, out_ref, *, use_relu: bool, mxu_dtype):
    # atoms_ref : (R, Fa)        f32    R = Bt * A   (rows of this block)
    # bonds_ref : (R, D*Fb)      f32    (degree axis flattened into K)
    # gedges_ref: (R, D)         int32  block-local neighbour row index, -1 = pad
    # wa_ref    : (Fa, Dmax*H)   f32    fused per-degree atom weights
    # wbr_ref   : (D*Fb, Dmax*H) f32    fused bond weights replicated along K
    # bias_ref  : (1, Dmax*H)    f32
    # dsel_ref  : (1, Dmax*H)    int32  degree index (1..Dmax) of each lane
    # dsum_ref  : (Dmax*H, H)    f32    0/1 selector that sums the Dmax slices
    # out_ref   : (R, H)         f32    final convolved atom features
    R = atoms_ref.shape[0]
    D = gedges_ref.shape[1]

    gedges = gedges_ref[...]                                     # (R, D)

    # Block-diagonal adjacency (+ identity for the "self" feature) and degree.
    col = jax.lax.broadcasted_iota(jnp.int32, (R, R), 1)
    row = jax.lax.broadcasted_iota(jnp.int32, (R, R), 0)
    adj = (row == col).astype(jnp.float32)                       # identity
    deg = jnp.zeros((R, 1), jnp.int32)
    for k in range(D):                                           # static unroll
        ek = gedges[:, k:k + 1]                                  # (R, 1)
        deg = deg + (ek >= 0).astype(jnp.int32)
        adj = adj + (ek == col).astype(jnp.float32)              # -1 never hits

    # Neighbour + self sum on the RAW atom features (small N), then one fused
    # lane-dense projection:  ((I + A) @ X) @ Wa  (==  X@Wa + A@(X@Wa)).
    s = jnp.dot(adj.astype(mxu_dtype), atoms_ref[...].astype(mxu_dtype),
                preferred_element_type=jnp.float32)              # (R, Fa)
    h = jnp.dot(s.astype(mxu_dtype), wa_ref[...].astype(mxu_dtype),
                preferred_element_type=jnp.float32)              # (R, Dmax*H)
    # Bond degree-sum folded into the weight matmul (Wb replicated along K).
    h = h + jnp.dot(bonds_ref[...].astype(mxu_dtype),
                    wbr_ref[...].astype(mxu_dtype),
                    preferred_element_type=jnp.float32)          # (R, Dmax*H)
    h = h + bias_ref[...]
    if use_relu:
        h = jnp.maximum(h, 0.0)

    # Degree-select: lane l belongs to degree dsel[l]; keep only deg == dsel,
    # then sum the Dmax slices down to H lanes with a 0/1 selector matmul
    # (cross-lane reduction on the MXU; at most one slice per row is nonzero).
    mask = deg == dsel_ref[...]                                  # (R, Dmax*H)
    h = jnp.where(mask, h, 0.0)
    out_ref[...] = jnp.dot(h, dsum_ref[...],
                           preferred_element_type=jnp.float32
                           ).astype(out_ref.dtype)               # (R, H)


def neural_graph_hidden(atoms, bonds, edges, wa, wb, bias, *,
                        use_relu=True, mxu_dtype=jnp.float32):
    """atoms (B,A,Fa), bonds (B,A,D,Fb), edges (B,A,D) int (-1 pad),
    wa (Dmax,Fa,H), wb (Dmax,Fb,H), bias (Dmax,H)  ->  (B,A,H)."""
    B, A, Fa = atoms.shape
    _, _, D, Fb = bonds.shape
    Dmax, _, H = wa.shape
    NH = Dmax * H

    # ---- choose samples per grid step so each block has >= ~128 MXU rows ----
    Bt = max(1, min(B, pl.cdiv(128, A)))
    while Bt < B and (Bt * A) % 8 != 0:      # keep block sublane dim 8-aligned
        Bt += 1
    B_pad = pl.cdiv(B, Bt) * Bt
    R = Bt * A                               # rows per block (adjacency is RxR)

    pad = B_pad - B
    edges = edges.astype(jnp.int32)
    if pad:
        atoms = jnp.pad(atoms, ((0, pad), (0, 0), (0, 0)))
        bonds = jnp.pad(bonds, ((0, pad), (0, 0), (0, 0), (0, 0)))
        edges = jnp.pad(edges, ((0, pad), (0, 0), (0, 0)), constant_values=-1)

    # Block-local neighbour row indices (sample offset inside its block).
    offs = ((jnp.arange(B_pad, dtype=jnp.int32) % Bt) * A).reshape(B_pad, 1, 1)
    gedges = jnp.where(edges >= 0, edges + offs, -1)

    # Wrapper-side layout plumbing (cheap reshapes / small constant tensors).
    atoms2d = atoms.reshape(B_pad * A, Fa)
    bonds2d = bonds.reshape(B_pad * A, D * Fb)
    gedges2d = gedges.reshape(B_pad * A, D)
    wa_f = jnp.transpose(wa, (1, 0, 2)).reshape(Fa, NH)          # (Fa, Dmax*H)
    wb_f = jnp.transpose(wb, (1, 0, 2)).reshape(Fb, NH)
    wb_rep = jnp.tile(wb_f, (D, 1))                              # (D*Fb, Dmax*H)
    bias2d = bias.reshape(1, NH)
    dsel = jnp.repeat(jnp.arange(1, Dmax + 1, dtype=jnp.int32), H).reshape(1, NH)
    dsum = jnp.tile(jnp.eye(H, dtype=jnp.float32), (Dmax, 1))    # (Dmax*H, H)

    out2d = pl.pallas_call(
        partial(ngh_kernel, use_relu=use_relu, mxu_dtype=mxu_dtype),
        out_shape=jax.ShapeDtypeStruct((B_pad * A, H), jnp.float32),
        grid_spec=pltpu.PrefetchScalarGridSpec(
            num_scalar_prefetch=0,
            grid=(B_pad // Bt,),
            in_specs=[
                pl.BlockSpec((R, Fa), lambda i: (i, 0)),
                pl.BlockSpec((R, D * Fb), lambda i: (i, 0)),
                pl.BlockSpec((R, D), lambda i: (i, 0)),
                pl.BlockSpec((Fa, NH), lambda i: (0, 0)),
                pl.BlockSpec((D * Fb, NH), lambda i: (0, 0)),
                pl.BlockSpec((1, NH), lambda i: (0, 0)),
                pl.BlockSpec((1, NH), lambda i: (0, 0)),
                pl.BlockSpec((NH, H), lambda i: (0, 0)),
            ],
            out_specs=pl.BlockSpec((R, H), lambda i: (i, 0)),
        ),
        compiler_params=pltpu.CompilerParams(
            dimension_semantics=("parallel",)),
    )(atoms2d, bonds2d, gedges2d, wa_f, wb_rep, bias2d, dsel, dsum)

    return out2d.reshape(B_pad, A, H)[:B]


def reference_forward(atoms, bonds, edges, wa, wb, bias, *, use_relu=True):
    """Pure-JAX reimplementation of the PyTorch forward (for verification)."""
    B, A, Fa = atoms.shape
    Dmax = wa.shape[0]
    deg = jnp.sum((edges != -1).astype(jnp.int32), axis=-1, keepdims=True)
    padded = jnp.pad(atoms, ((0, 0), (1, 0), (0, 0)))            # zero row 0
    idx = edges + 1                                              # (B, A, D)
    batch_idx = jnp.arange(B).reshape(B, 1, 1)
    gathered = padded[batch_idx, idx]                            # (B, A, D, Fa)
    summed_atom = atoms + jnp.sum(gathered, axis=2)
    summed_bond = jnp.sum(bonds, axis=2)
    feats = jnp.concatenate([summed_atom, summed_bond], axis=-1)
    W = jnp.concatenate([wa, wb], axis=1)                        # (Dmax, F, H)
    acc = 0.0
    for d in range(Dmax):
        h = jnp.einsum('baf,fh->bah', feats, W[d]) + bias[d][None, None, :]
        if use_relu:
            h = jnp.maximum(h, 0.0)
        acc = acc + h * (deg == d + 1).astype(jnp.float32)
    return acc


if __name__ == "__main__":
    # Small deterministic example (exercises multi-block grid + batch padding).
    B, A, D = 10, 16, 4               # batch, max_atoms, max_degree
    Fa, Fb, H = 8, 6, 32              # atom feats, bond feats, conv_width
    Dmax = D
    F = Fa + Fb

    key = jax.random.PRNGKey(0)
    k1, k2, k3, k4, k5 = jax.random.split(key, 5)

    atoms = jax.random.normal(k1, (B, A, Fa), dtype=jnp.float32)
    bonds = jax.random.normal(k2, (B, A, D, Fb), dtype=jnp.float32)
    edges = jax.random.randint(k3, (B, A, D), minval=-1, maxval=A,
                               dtype=jnp.int32)                  # -1 = no edge

    # Per-degree Linear weights (xavier-normal-like) and small biases.
    std = (2.0 / (F + H)) ** 0.5
    W_all = std * jax.random.normal(k4, (Dmax, F, H), dtype=jnp.float32)
    wa = W_all[:, :Fa, :]             # (Dmax, Fa, H)
    wb = W_all[:, Fa:, :]             # (Dmax, Fb, H)
    bias = 0.1 * jax.random.normal(k5, (Dmax, H), dtype=jnp.float32)

    out = neural_graph_hidden(atoms, bonds, edges, wa, wb, bias, use_relu=True)
    out = jax.block_until_ready(out)

    ref = reference_forward(atoms, bonds, edges, wa, wb, bias, use_relu=True)
    if not bool(jnp.allclose(out, ref, atol=1e-3, rtol=1e-3)):
        raise AssertionError("Pallas kernel output does not match reference")

    print("KERNEL_OK")
</pallas_src>

<mosaic_0001>
module attributes {stable_mosaic.version = 11 : i64} {
  func.func @ngh_kernel(%arg0: i32, %arg1: memref<128x8xf32, #tpu.memory_space<vmem>>, %arg2: memref<128x24xf32, #tpu.memory_space<vmem>>, %arg3: memref<128x4xi32, #tpu.memory_space<vmem>>, %arg4: memref<8x128xf32, #tpu.memory_space<vmem>>, %arg5: memref<24x128xf32, #tpu.memory_space<vmem>>, %arg6: memref<1x128xf32, #tpu.memory_space<vmem>>, %arg7: memref<1x128xi32, #tpu.memory_space<vmem>>, %arg8: memref<128x32xf32, #tpu.memory_space<vmem>>, %arg9: memref<128x32xf32, #tpu.memory_space<vmem>>) attributes {dimension_semantics = [#tpu.dimension_semantics<parallel>], iteration_bounds = array<i64: 2>, scalar_prefetch = 0 : i64, scratch_operands = 0 : i64, tpu.core_type = #tpu.core_type<tc>, window_params = [{transform_indices = @transform_0, window_bounds = array<i64: 128, 8>}, {transform_indices = @transform_1, window_bounds = array<i64: 128, 24>}, {transform_indices = @transform_2, window_bounds = array<i64: 128, 4>}, {pipeline_mode = #tpu.pipeline_mode<synchronous>, transform_indices = @transform_3, window_bounds = array<i64: 8, 128>}, {pipeline_mode = #tpu.pipeline_mode<synchronous>, transform_indices = @transform_4, window_bounds = array<i64: 24, 128>}, {pipeline_mode = #tpu.pipeline_mode<synchronous>, transform_indices = @transform_5, window_bounds = array<i64: 1, 128>}, {pipeline_mode = #tpu.pipeline_mode<synchronous>, transform_indices = @transform_6, window_bounds = array<i64: 1, 128>}, {pipeline_mode = #tpu.pipeline_mode<synchronous>, transform_indices = @transform_7, window_bounds = array<i64: 128, 32>}, {transform_indices = @transform_8, window_bounds = array<i64: 128, 32>}]} {
    %c0 = arith.constant 0 : index
    %c0_0 = arith.constant 0 : index
    %0 = vector.load %arg3[%c0, %c0_0] : memref<128x4xi32, #tpu.memory_space<vmem>>, vector<128x4xi32>
    %1 = tpu.iota {dimensions = array<i32: 1>} : vector<128x128xi32>
    %2 = tpu.iota {dimensions = array<i32: 0>} : vector<128x128xi32>
    %3 = arith.cmpi eq, %2, %1 : vector<128x128xi32>
    %4 = arith.extui %3 : vector<128x128xi1> to vector<128x128xi32>
    %5 = arith.sitofp %4 : vector<128x128xi32> to vector<128x128xf32>
    %c0_i32 = arith.constant 0 : i32
    %6 = vector.broadcast %c0_i32 : i32 to vector<128x1xi32>
    %7 = vector.extract_strided_slice %0 {offsets = [0, 0], sizes = [128, 1], strides = [1, 1]} : vector<128x4xi32> to vector<128x1xi32>
    %c0_i32_1 = arith.constant 0 : i32
    %8 = vector.broadcast %c0_i32_1 : i32 to vector<128x1xi32>
    %9 = arith.cmpi sge, %7, %8 : vector<128x1xi32>
    %10 = arith.extui %9 : vector<128x1xi1> to vector<128x1xi32>
    %11 = arith.addi %6, %10 : vector<128x1xi32>
    %12 = vector.broadcast %7 : vector<128x1xi32> to vector<128x128xi32>
    %13 = arith.cmpi eq, %12, %1 : vector<128x128xi32>
    %14 = arith.extui %13 : vector<128x128xi1> to vector<128x128xi32>
    %15 = arith.sitofp %14 : vector<128x128xi32> to vector<128x128xf32>
    %16 = arith.addf %5, %15 : vector<128x128xf32>
    %17 = vector.extract_strided_slice %0 {offsets = [0, 1], sizes = [128, 1], strides = [1, 1]} : vector<128x4xi32> to vector<128x1xi32>
    %c0_i32_2 = arith.constant 0 : i32
    %18 = vector.broadcast %c0_i32_2 : i32 to vector<128x1xi32>
    %19 = arith.cmpi sge, %17, %18 : vector<128x1xi32>
    %20 = arith.extui %19 : vector<128x1xi1> to vector<128x1xi32>
    %21 = arith.addi %11, %20 : vector<128x1xi32>
    %22 = vector.broadcast %17 : vector<128x1xi32> to vector<128x128xi32>
    %23 = arith.cmpi eq, %22, %1 : vector<128x128xi32>
    %24 = arith.extui %23 : vector<128x128xi1> to vector<128x128xi32>
    %25 = arith.sitofp %24 : vector<128x128xi32> to vector<128x128xf32>
    %26 = arith.addf %16, %25 : vector<128x128xf32>
    %27 = vector.extract_strided_slice %0 {offsets = [0, 2], sizes = [128, 1], strides = [1, 1]} : vector<128x4xi32> to vector<128x1xi32>
    %c0_i32_3 = arith.constant 0 : i32
    %28 = vector.broadcast %c0_i32_3 : i32 to vector<128x1xi32>
    %29 = arith.cmpi sge, %27, %28 : vector<128x1xi32>
    %30 = arith.extui %29 : vector<128x1xi1> to vector<128x1xi32>
    %31 = arith.addi %21, %30 : vector<128x1xi32>
    %32 = vector.broadcast %27 : vector<128x1xi32> to vector<128x128xi32>
    %33 = arith.cmpi eq, %32, %1 : vector<128x128xi32>
    %34 = arith.extui %33 : vector<128x128xi1> to vector<128x128xi32>
    %35 = arith.sitofp %34 : vector<128x128xi32> to vector<128x128xf32>
    %36 = arith.addf %26, %35 : vector<128x128xf32>
    %37 = vector.extract_strided_slice %0 {offsets = [0, 3], sizes = [128, 1], strides = [1, 1]} : vector<128x4xi32> to vector<128x1xi32>
    %c0_i32_4 = arith.constant 0 : i32
    %38 = vector.broadcast %c0_i32_4 : i32 to vector<128x1xi32>
    %39 = arith.cmpi sge, %37, %38 : vector<128x1xi32>
    %40 = arith.extui %39 : vector<128x1xi1> to vector<128x1xi32>
    %41 = arith.addi %31, %40 : vector<128x1xi32>
    %42 = vector.broadcast %37 : vector<128x1xi32> to vector<128x128xi32>
    %43 = arith.cmpi eq, %42, %1 : vector<128x128xi32>
    %44 = arith.extui %43 : vector<128x128xi1> to vector<128x128xi32>
    %45 = arith.sitofp %44 : vector<128x128xi32> to vector<128x128xf32>
    %46 = arith.addf %36, %45 : vector<128x128xf32>
    %c0_5 = arith.constant 0 : index
    %c0_6 = arith.constant 0 : index
    %47 = vector.load %arg1[%c0_5, %c0_6] : memref<128x8xf32, #tpu.memory_space<vmem>>, vector<128x8xf32>
    %cst = arith.constant dense<0.000000e+00> : vector<128x8xf32>
    %48 = tpu.matmul %46, %47, %cst {dimension_numbers = #tpu.dot_dimension_numbers<[1], [0], [0], [1], [0, 0, 1, 1], [], []>} : vector<128x128xf32>, vector<128x8xf32>, vector<128x8xf32> -> vector<128x8xf32>
    %c0_7 = arith.constant 0 : index
    %c0_8 = arith.constant 0 : index
    %49 = vector.load %arg4[%c0_7, %c0_8] : memref<8x128xf32, #tpu.memory_space<vmem>>, vector<8x128xf32>
    %cst_9 = arith.constant dense<0.000000e+00> : vector<128x128xf32>
    %50 = tpu.matmul %48, %49, %cst_9 {dimension_numbers = #tpu.dot_dimension_numbers<[1], [0], [0], [1], [0, 0, 1, 1], [], []>} : vector<128x8xf32>, vector<8x128xf32>, vector<128x128xf32> -> vector<128x128xf32>
    %c0_10 = arith.constant 0 : index
    %c0_11 = arith.constant 0 : index
    %51 = vector.load %arg2[%c0_10, %c0_11] : memref<128x24xf32, #tpu.memory_space<vmem>>, vector<128x24xf32>
    %c0_12 = arith.constant 0 : index
    %c0_13 = arith.constant 0 : index
    %52 = vector.load %arg5[%c0_12, %c0_13] : memref<24x128xf32, #tpu.memory_space<vmem>>, vector<24x128xf32>
    %cst_14 = arith.constant dense<0.000000e+00> : vector<128x128xf32>
    %53 = tpu.matmul %51, %52, %cst_14 {dimension_numbers = #tpu.dot_dimension_numbers<[1], [0], [0], [1], [0, 0, 1, 1], [], []>} : vector<128x24xf32>, vector<24x128xf32>, vector<128x128xf32> -> vector<128x128xf32>
    %54 = arith.addf %50, %53 : vector<128x128xf32>
    %c0_15 = arith.constant 0 : index
    %c0_16 = arith.constant 0 : index
    %55 = vector.load %arg6[%c0_15, %c0_16] : memref<1x128xf32, #tpu.memory_space<vmem>>, vector<1x128xf32>
    %56 = vector.broadcast %55 : vector<1x128xf32> to vector<128x128xf32>
    %57 = arith.addf %54, %56 : vector<128x128xf32>
    %cst_17 = arith.constant 0.000000e+00 : f32
    %58 = vector.broadcast %cst_17 : f32 to vector<128x128xf32>
    %59 = arith.maximumf %57, %58 : vector<128x128xf32>
    %c0_18 = arith.constant 0 : index
    %c0_19 = arith.constant 0 : index
    %60 = vector.load %arg7[%c0_18, %c0_19] : memref<1x128xi32, #tpu.memory_space<vmem>>, vector<1x128xi32>
    %61 = vector.broadcast %41 : vector<128x1xi32> to vector<128x128xi32>
    %62 = vector.broadcast %60 : vector<1x128xi32> to vector<128x128xi32>
    %63 = arith.cmpi eq, %61, %62 : vector<128x128xi32>
    %cst_20 = arith.constant 0.000000e+00 : f32
    %64 = vector.broadcast %cst_20 : f32 to vector<128x128xf32>
    %65 = arith.select %63, %59, %64 : vector<128x128xi1>, vector<128x128xf32>
    %c0_21 = arith.constant 0 : index
    %c0_22 = arith.constant 0 : index
    %66 = vector.load %arg8[%c0_21, %c0_22] : memref<128x32xf32, #tpu.memory_space<vmem>>, vector<128x32xf32>
    %cst_23 = arith.constant dense<0.000000e+00> : vector<128x32xf32>
    %67 = tpu.matmul %65, %66, %cst_23 {dimension_numbers = #tpu.dot_dimension_numbers<[1], [0], [0], [1], [0, 0, 1, 1], [], []>} : vector<128x128xf32>, vector<128x32xf32>, vector<128x32xf32> -> vector<128x32xf32>
    %c0_24 = arith.constant 0 : index
    %c0_25 = arith.constant 0 : index
    %68 = vector.load %arg9[%c0_24, %c0_25] : memref<128x32xf32, #tpu.memory_space<vmem>>, vector<128x32xf32>
    tpu.vector_store %arg9[%c0_24, %c0_25], %67 {strides = array<i32>} : memref<128x32xf32, #tpu.memory_space<vmem>>, vector<128x32xf32>,
    return
  }
  func.func @transform_0(%arg0: i32) -> (i32, i32) {
    %c0_i32 = arith.constant 0 : i32
    %c0_i32_0 = arith.constant 0 : i32
    return %arg0, %c0_i32 : i32, i32
  }
  func.func @transform_1(%arg0: i32) -> (i32, i32) {
    %c0_i32 = arith.constant 0 : i32
    %c0_i32_0 = arith.constant 0 : i32
    return %arg0, %c0_i32 : i32, i32
  }
  func.func @transform_2(%arg0: i32) -> (i32, i32) {
    %c0_i32 = arith.constant 0 : i32
    %c0_i32_0 = arith.constant 0 : i32
    return %arg0, %c0_i32 : i32, i32
  }
  func.func @transform_3(%arg0: i32) -> (i32, i32) {
    %c0_i32 = arith.constant 0 : i32
    %c0_i32_0 = arith.constant 0 : i32
    %c0_i32_1 = arith.constant 0 : i32
    return %c0_i32, %c0_i32_0 : i32, i32
  }
  func.func @transform_4(%arg0: i32) -> (i32, i32) {
    %c0_i32 = arith.constant 0 : i32
    %c0_i32_0 = arith.constant 0 : i32
    %c0_i32_1 = arith.constant 0 : i32
    return %c0_i32, %c0_i32_0 : i32, i32
  }
  func.func @transform_5(%arg0: i32) -> (i32, i32) {
    %c0_i32 = arith.constant 0 : i32
    %c0_i32_0 = arith.constant 0 : i32
    %c0_i32_1 = arith.constant 0 : i32
    return %c0_i32, %c0_i32_0 : i32, i32
  }
  func.func @transform_6(%arg0: i32) -> (i32, i32) {
    %c0_i32 = arith.constant 0 : i32
    %c0_i32_0 = arith.constant 0 : i32
    %c0_i32_1 = arith.constant 0 : i32
    return %c0_i32, %c0_i32_0 : i32, i32
  }
  func.func @transform_7(%arg0: i32) -> (i32, i32) {
    %c0_i32 = arith.constant 0 : i32
    %c0_i32_0 = arith.constant 0 : i32
    %c0_i32_1 = arith.constant 0 : i32
    return %c0_i32, %c0_i32_0 : i32, i32
  }
  func.func @transform_8(%arg0: i32) -> (i32, i32) {
    %c0_i32 = arith.constant 0 : i32
    %c0_i32_0 = arith.constant 0 : i32
    return %arg0, %c0_i32 : i32, i32
  }
}

</mosaic_0001>

<bundles_post_ra>
// kernel: tpu_custom_call.1
= control target key start
LH: loop header
LB: loop body
LE: loop exit
PB: predicated region body
PF: predicated region fallthrough
CT: control target
= control target key end

     0   :  { %s2570_s27 = smov 0   ;;  %s3440_s0 = inlined_call_operand.vmem [shape: f32[256,8], index: 0, kind: input, shape index: {}]   ;;  %s3441_s1 = inlined_call_operand.vmem [shape: f32[256,24], index: 1, kind: input, shape index: {}]   ;;  %s3442_s2 = inlined_call_operand.vmem [shape: s32[256,4], index: 2, kind: input, shape index: {}]   ;;  %s3443_s3 = inlined_call_operand.vmem [shape: f32[8,128], index: 3, kind: input, shape index: {}]   ;;  %s3444_s4 = inlined_call_operand.vmem [shape: f32[24,128], index: 4, kind: input, shape index: {}]   ;;  %s3445_s5 = inlined_call_operand.vmem [shape: f32[1,128], index: 5, kind: input, shape index: {}]   ;;  %s3446_s6 = inlined_call_operand.vmem [shape: s32[1,128], index: 6, kind: input, shape index: {}]   ;;  %s3447_s7 = inlined_call_operand.vmem [shape: f32[128,32], index: 7, kind: input, shape index: {}]   ;;  %s3448_s8 = inlined_call_operand.vmem [shape: f32[256,32], index: 8, kind: output, shape index: {}]  }
   0x1 LB: > { %s2011_s28 = sadd.s32 4294967295, %s2515_s27   ;;  %p2015_p0 = scmp.ge.s32.totalorder %s2515_s27, 1  ;;  %s2515_s27 = sphi %s2570_s27, %s18_s27  }
   0x2   : > { %p285_p1 = scmp.lt.s32.totalorder %s2515_s27, 3 }
   0x4   : > { %p286_p2 = pnand %p2015_p0, %p285_p1 }
   0x5   : > { %s2016_s29 = sshll.u32 (!%p286_p2), %s2011_s28, 4  ;;  %s2522_s15 = smov (!%p286_p2), 127  }
   0x6   : > { %289 = sbr.rel (%p286_p2) target bundleno = 926 (0x39e), region = 52  ;;  %p330_p3 = scmp.lt.s32.totalorder (!%p286_p2), %s2016_s29, 31 }
   0x7   : > { %s2523_s16 = smov (!%p286_p2), 126   ;;  %s2524_s26 = smov (!%p286_p2), 125  }
   0xb   : > { %v2517_v0 = vmov 3   ;;  %v2518_v1 = vmov 1   ;;  %s3450_s29 = smov (!%p330_p3, %s2016_s29), 31  ;;  %v2519_v9 = vmov 2   ;;  %v2520_v14 = vmov 0  }
   0xc   : > { %2476 = vset.pattern.permute.xlu0 %v2517_v0  ;;  %2472 = vset.pattern.permute.xlu1 %v2518_v1  ;;  %s2580_s30 = sshll.u32 %s3450_s29, 3  ;;  %v369_v39 = vlaneseq  ;;  %v2521_v47 = vmov 0.0  }
   0xd   : > { %s2586_s11 = scalar_lea.vmem %s3442_s2, %s2580_s30  ;;  %s2600_s14 = scalar_lea.vmem %s3440_s0, %s2580_s30 }
   0xe   : > { %v2589_v2 = vld [vmem:[%s2586_s11 + $0x8] sm:$0xff]  ;;  %v2592_v3 = vld [vmem:[%s2586_s11] sm:$0xff]  ;;  %v2603_v4 = vld [vmem:[%s2586_s11 + $0x10] sm:$0xff]  ;;  %v2736_v42 = vshrl.u32 %v369_v39, 7  ;;  %v2738_v43 = vand.u32 127, %v369_v39  ;;  %s2884_s25 = scalar_lea.vmem %s3441_s1, %s2580_s30  ;;  %s3403_s28 = scalar_lea.vmem %s3448_s8, %s2580_s30 }
   0xf   : > { %952 = vperm.xlu0 %2476, %v2589_v2   ;;  %629 = vperm.xlu1 %2472, %v2592_v3   ;;  %v1075_v5 = vld [vmem:[%s2600_s14 + $0x78] sm:$0xff]  ;;  %v1074_v6 = vld [vmem:[%s2600_s14 + $0x70] sm:$0xff]  ;;  %v1073_v8 = vld [vmem:[%s2600_s14 + $0x68] sm:$0xff]  ;;  %vm436_vm10 = vcmp.ge.s32.totalorder %v2592_v3, 0  ;;  %vm438_vm13 = vcmp.ge.s32.totalorder %v2603_v4, 0 }
  0x10   : > { %v2610_v7 = vld [vmem:[%s2586_s11 + $0x38] sm:$0xff]  ;;  %2256 = vmatprep.subr.mxu0 %v1075_v5  ;;  %v2617_v10 = vld [vmem:[%s2586_s11 + $0x40] sm:$0xff]  ;;  %v1070_v13 = vld [vmem:[%s2600_s14 + $0x50] sm:$0xff]  ;;  %vm388_vm0 = vcmp.eq.s32.totalorder %v2736_v42, %v2738_v43  ;;  %v373_v46 = vadd.s32 8, %v2736_v42 }
  0x11   : > { %2257 = vmatpush3.msra.mxu0 %v1075_v5  ;;  %v1072_v11 = vld [vmem:[%s2600_s14 + $0x60] sm:$0xff]  ;;  %v1071_v12 = vld [vmem:[%s2600_s14 + $0x58] sm:$0xff]  ;;  %v1069_v15 = vld [vmem:[%s2600_s14 + $0x48] sm:$0xff]  ;;  %v2024_v48 = vsel %vm388_vm0, 1.0, %v2521_v47 }
  0x12   : > { %2258 = vmatprep.subr.mxu0 %v1074_v6  ;;  %v1068_v16 = vld [vmem:[%s2600_s14 + $0x40] sm:$0xff]  ;;  %v2631_v17 = vld [vmem:[%s2586_s11 + $0x18] sm:$0xff]  ;;  %v1066_v19 = vld [vmem:[%s2600_s14 + $0x30] sm:$0xff]  ;;  %vm389_vm3 = vcmp.eq.s32.totalorder %v373_v46, %v2738_v43  ;;  %v376_v46 = vadd.s32 32, %v2736_v42 }
  0x13   : > { %955 = vperm.xlu0 %2476, %v2603_v4   ;;  %632 = vperm.xlu1 %2472, %v2589_v2   ;;  %v1067_v18 = vld [vmem:[%s2600_s14 + $0x38] sm:$0xff]  ;;  %v1065_v20 = vld [vmem:[%s2600_s14 + $0x28] sm:$0xff]  ;;  %v2641_v21 = vld [vmem:[%s2586_s11 + $0x20] sm:$0xff]  ;;  %v2025_v54 = vsel %vm389_vm3, 1.0, %v2521_v47 }
  0x14   : > { %2259 = vmatpush3.msra.mxu0 %v1074_v6  ;;  %v1064_v22 = vld [vmem:[%s2600_s14 + $0x20] sm:$0xff]  ;;  %v1063_v23 = vld [vmem:[%s2600_s14 + $0x18] sm:$0xff]  ;;  %v2649_v24 = vld [vmem:[%s2586_s11 + $0x28] sm:$0xff]  ;;  %vm392_vm12 = vcmp.eq.s32.totalorder %v376_v46, %v2738_v43 }
  0x15   : > { %2260 = vmatprep.subr.mxu0 %v1073_v8  ;;  %v1062_v25 = vld [vmem:[%s2600_s14 + $0x10] sm:$0xff]  ;;  %v1061_v26 = vld [vmem:[%s2600_s14 + $0x8] sm:$0xff]  ;;  %v1060_v28 = vld [vmem:[%s2600_s14] sm:$0xff] }
  0x16   : > { %2261 = vmatpush3.msra.mxu0 %v1073_v8  ;;  %v2657_v27 = vld [vmem:[%s2586_s11 + $0x30] sm:$0xff]  ;;  %v2663_v29 = vld [vmem:[%s2586_s11 + $0x58] sm:$0xff]  ;;  %v2669_v30 = vld [vmem:[%s2586_s11 + $0x60] sm:$0xff] }
  0x17   : > { %970 = vperm.xlu0 %2476, %v2610_v7   ;;  %2473 = vset.pattern.permute.xlu1 %v2519_v9  ;;  %v2694_v31 = vld [vmem:[%s2586_s11 + $0x68] sm:$0xff]  ;;  %v2703_v33 = vld [vmem:[%s2586_s11 + $0x70] sm:$0xff] }
  0x18   : > { %789 = vperm.xlu1 %2473, %v2592_v3   ;;  %2262 = vmatprep.subr.mxu0 %v1072_v11  ;;  %v2700_v32 = vld [vmem:[%s2586_s11 + $0x48] sm:$0xff]  ;;  %v2718_v34 = vld [vmem:[%s2586_s11 + $0x50] sm:$0xff] }
  0x19   : > { %2263 = vmatpush3.msra.mxu0 %v1072_v11 }
  0x1a   : > { %2264 = vmatprep.subr.mxu0 %v1071_v12 }
  0x1b   : > { %973 = vperm.xlu0 %2476, %v2617_v10   ;;  %2265 = vmatpush3.msra.mxu0 %v1071_v12 }
  0x1c   : > { %792 = vperm.xlu1 %2473, %v2589_v2   ;;  %2266 = vmatprep.subr.mxu0 %v1070_v13 }
  0x1d   : > { %2267 = vmatpush3.msra.mxu0 %v1070_v13 }
  0x1e   : > { %2268 = vmatprep.subr.mxu0 %v1069_v15 }
  0x1f   : > { %2492 = vset.pattern.permute.xlu0 %v2520_v14  ;;  %2269 = vmatpush3.msra.mxu0 %v1069_v15 }
  0x20   : > { %469 = vperm.xlu0 %2492, %v2592_v3   ;;  %2474 = vset.pattern.permute.xlu1 %v2517_v0 }
  0x21   : > { %949 = vperm.xlu1 %2474, %v2592_v3   ;;  %2270 = vmatprep.subr.mxu0 %v1068_v16  ;;  %v375_v3 = vadd.s32 24, %v2736_v42 }
  0x22   : > { %2271 = vmatpush3.msra.mxu0 %v1068_v16 }
  0x23   : > { %2272 = vmatprep.subr.mxu0 %v1067_v18  ;;  %vm391_vm0 = vcmp.eq.s32.totalorder %v375_v3, %v2738_v43 }
  0x24   : > { %472 = vperm.xlu0 %2492, %v2589_v2   ;;  %2273 = vmatpush3.msra.mxu0 %v1067_v18 }
  0x25   : > { %2475 = vset.pattern.permute.xlu1 %v2518_v1  ;;  %2274 = vmatprep.subr.mxu0 %v1066_v19 }
  0x26   : > { %638 = vperm.xlu1 %2475, %v2631_v17   ;;  %2275 = vmatpush3.msra.mxu0 %v1066_v19 }
  0x27   : > { %2276 = vmatprep.subr.mxu0 %v1065_v20 }
  0x28   : > { %475 = vperm.xlu0 %2492, %v2603_v4   ;;  %2277 = vmatpush3.msra.mxu0 %v1065_v20 }
  0x29   : > { %2278 = vmatprep.subr.mxu0 %v1064_v22 }
  0x2a   : > { %2477 = vset.pattern.permute.xlu1 %v2520_v14  ;;  %2279 = vmatpush3.msra.mxu0 %v1064_v22  ;;  %v2782_v22 = vld [vmem:[%s2586_s11 + $0x78] sm:$0xff] }
  0x2b   : > { %481 = vperm.xlu1 %2477, %v2641_v21   ;;  %2280 = vmatprep.subr.mxu0 %v1063_v23 }
  0x2c   : > { %478 = vperm.xlu0 %2492, %v2631_v17   ;;  %2281 = vmatpush3.msra.mxu0 %v1063_v23 }
  0x2d   : > { %2282 = vmatprep.subr.mxu0 %v1062_v25 }
  0x2e   : > { %2283 = vmatpush3.msra.mxu0 %v1062_v25 }
  0x2f   : > { %2478 = vset.pattern.permute.xlu1 %v2519_v9  ;;  %2284 = vmatprep.subr.mxu0 %v1061_v26 }
  0x30   : > { %484 = vperm.xlu0 %2492, %v2649_v24   ;;  %795 = vperm.xlu1 %2478, %v2603_v4  }
  0x31   : > { %2285 = vmatpush3.msra.mxu0 %v1061_v26 }
  0x32   : > { %2286 = vmatprep.subr.mxu0 %v1060_v28 }
  0x33   : > { %2287 = vmatpush3.msra.mxu0 %v1060_v28 }
  0x34   : > { %487 = vperm.xlu0 %2492, %v2657_v27   ;;  %798 = vperm.xlu1 %2478, %v2631_v17  }
  0x38   : > { %502 = vperm.xlu0 %2492, %v2663_v29   ;;  %2479 = vset.pattern.permute.xlu1 %v2518_v1 }
  0x39   : > { %641 = vperm.xlu1 %2479, %v2641_v21  }
  0x3c   : > { %505 = vperm.xlu0 %2492, %v2669_v30  }
  0x3d   : > { %644 = vperm.xlu1 %2479, %v2649_v24  }
  0x40   : > { %2494 = vset.pattern.permute.xlu0 %v2519_v9 }
  0x41   : > { %804 = vperm.xlu0 %2494, %v2649_v24   ;;  %2480 = vset.pattern.permute.xlu1 %v2517_v0 }
  0x42   : > { %958 = vperm.xlu1 %2480, %v2631_v17  }
  0x45   : > { %807 = vperm.xlu0 %2494, %v2657_v27  }
  0x46   : > { %2481 = vset.pattern.permute.xlu1 %v2519_v9 }
  0x47   : > { %801 = vperm.xlu1 %2481, %v2641_v21  }
  0x49   : > { %822 = vperm.xlu0 %2494, %v2663_v29  }
  0x4b   : > { %2482 = vset.pattern.permute.xlu1 %v2520_v14 }
  0x4c   : > { %490 = vperm.xlu1 %2482, %v2610_v7  }
  0x4d   : > { %825 = vperm.xlu0 %2494, %v2669_v30  }
  0x50   : > { %2483 = vset.pattern.permute.xlu1 %v2518_v1 }
  0x51   : > { %2500 = vset.pattern.permute.xlu0 %v2518_v1  ;;  %647 = vperm.xlu1 %2483, %v2657_v27  }
  0x52   : > { %635 = vperm.xlu0 %2500, %v2603_v4  }
  0x55   : > { %2484 = vset.pattern.permute.xlu1 %v2517_v0 }
  0x56   : > { %650 = vperm.xlu0 %2500, %v2610_v7   ;;  %961 = vperm.xlu1 %2484, %v2641_v21  }
  0x5a   : > { %964 = vperm.xlu1 %2484, %v2649_v24   ;;  %653 = vperm.xlu0 %2500, %v2617_v10  }
  0x5e   : > { %2485 = vset.pattern.permute.xlu1 %v2520_v14  ;;  %668 = vperm.xlu0 %2500, %v2694_v31  }
  0x5f   : > { %493 = vperm.xlu1 %2485, %v2617_v10  }
  0x62   : > { %671 = vperm.xlu0 %2500, %v2703_v33  }
  0x63   : > { %496 = vperm.xlu1 %2485, %v2700_v32  }
  0x66   : > { %2504 = vset.pattern.permute.xlu0 %v2517_v0 }
  0x67   : > { %2486 = vset.pattern.permute.xlu1 %v2519_v9  ;;  %988 = vperm.xlu0 %2504, %v2694_v31  }
  0x68   : > { %810 = vperm.xlu1 %2486, %v2610_v7  }
  0x6b   : > { %991 = vperm.xlu0 %2504, %v2703_v33  }
  0x6c   : > { %2487 = vset.pattern.permute.xlu1 %v2517_v0 }
  0x6d   : > { %967 = vperm.xlu1 %2487, %v2657_v27  }
  0x6f   : > { %2507 = vset.pattern.permute.xlu0 %v2520_v14 }
  0x71   : > { %2488 = vset.pattern.permute.xlu1 %v2518_v1 }
  0x72   : > { %656 = vperm.xlu1 %2488, %v2700_v32  }
  0x76   : > { %2489 = vset.pattern.permute.xlu1 %v2520_v14 }
  0x77   : > { %499 = vperm.xlu1 %2489, %v2718_v34  }
  0x7b   : > { %2490 = vset.pattern.permute.xlu1 %v2519_v9 }
  0x7c   : > { %813 = vperm.xlu1 %2490, %v2617_v10  }
  0x80   : > { %816 = vperm.xlu1 %2490, %v2700_v32  }
  0x84   : > { %2491 = vset.pattern.permute.xlu1 %v2518_v1 }
  0x85   : > { %659 = vperm.xlu1 %2491, %v2718_v34  }
  0x89   : > { %662 = vperm.xlu1 %2491, %v2663_v29  }
  0x8a   : > { %v630_v35 = vpop.permute.xlu1 %629  ;;  %v953_v36 = vpop.permute.xlu0 %952 }
  0x8b   : > { %vm676_vm1 = vcmp.eq.s32.totalorder %v630_v35, %v2738_v43  ;;  %vm997_vm8 = vcmp.eq.s32.totalorder %v953_v36, %v2738_v43 }
  0x8c   : > { %v2056_v53 = vsel %vm676_vm1, 1.0, %v2521_v47  ;;  %v2089_v11 = vsel %vm997_vm8, 1.0, %v2521_v47 }
  0x8d   : > { %2493 = vset.pattern.permute.xlu1 %v2517_v0 }
  0x8e   : > { %976 = vperm.xlu1 %2493, %v2700_v32   ;;  %v633_v37 = vpop.permute.xlu1 %632  ;;  %v2730_v38 = vpop.permute.xlu0 %955 }
  0x8f   : > { %vm677_vm5 = vcmp.eq.s32.totalorder %v633_v37, %v2738_v43  ;;  %vm998_vm3 = vcmp.eq.s32.totalorder %v2730_v38, %v2738_v43 }
  0x90   : > { %v2057_v62 = vsel %vm677_vm5, 1.0, %v2521_v47 }
  0x92   : > { %2495 = vset.pattern.permute.xlu1 %v2519_v9  ;;  %v2733_v40 = vpop.permute.xlu0 %970 }
  0x93   : > { %819 = vperm.xlu1 %2495, %v2718_v34   ;;  %v790_v41 = vpop.permute.xlu1 %789 }
  0x94   : > { %vm836_vm4 = vcmp.eq.s32.totalorder %v790_v41, %v2738_v43  ;;  %v2808_v41 = vsel %vm436_vm10, 1, %v2520_v14  ;;  %vm440_vm10 = vcmp.ge.s32.totalorder %v2641_v21, 0 }
  0x95   : > { %v2072_v57 = vsel %vm836_vm4, 1.0, %v2521_v47  ;;  %580 = vrot.lane.b32.xlu0 %v2808_v41, %s2522_s15  ;;  %vm439_vm4 = vcmp.ge.s32.totalorder %v2631_v17, 0  ;;  %v2090_v17 = vsel %vm998_vm3, 1.0, %v2521_v47  ;;  %vm447_vm3 = vcmp.ge.s32.totalorder %v2663_v29, 0 }
  0x96   : > { %v2740_v44 = vpop.permute.xlu0 %973 }
  0x97   : > { %2496 = vset.pattern.permute.xlu1 %v2520_v14  ;;  %v793_v45 = vpop.permute.xlu1 %792 }
  0x98   : > { %508 = vperm.xlu1 %2496, %v2694_v31   ;;  %vm837_vm9 = vcmp.eq.s32.totalorder %v793_v45, %v2738_v43  ;;  %v374_v45 = vadd.s32 16, %v2736_v42 }
  0x99   : > { %v2073_v12 = vsel %vm837_vm9, 1.0, %v2521_v47  ;;  %740 = vrot.lane.b32.xlu0 %v2808_v41, %s2523_s16  ;;  %vm1241_vm9 = vcmask 195584  }
  0x9a   : > { %vm390_vm11 = vcmp.eq.s32.totalorder %v374_v45, %v2738_v43  ;;  %v1225_v45 = vld [vmem:[%s2884_s25 + $0x18] sm:$0xff] }
  0x9b   : > { %v470_v49 = vpop.permute.xlu0 %469 }
  0x9c   : > { %vm516_vm2 = vcmp.eq.s32.totalorder %v470_v49, %v2738_v43  ;;  %2497 = vset.pattern.permute.xlu1 %v2518_v1  ;;  %v950_v50 = vpop.permute.xlu1 %949  ;;  %v377_v49 = vadd.s32 40, %v2736_v42 }
  0x9d   : > { %v2040_v51 = vsel %vm516_vm2, 1.0, %v2521_v47  ;;  %665 = vperm.xlu1 %2497, %v2669_v30   ;;  %vm996_vm6 = vcmp.eq.s32.totalorder %v950_v50, %v2738_v43 }
  0x9e   : > { %v564_v52 = vadd.f32 %v2040_v51, %v2024_v48  ;;  %v2088_v5 = vsel %vm996_vm6, 1.0, %v2521_v47  ;;  %v2026_v51 = vsel %vm390_vm11, 1.0, %v2521_v47  ;;  %vm393_vm2 = vcmp.eq.s32.totalorder %v377_v49, %v2738_v43  ;;  %v1226_v49 = vld [vmem:[%s2884_s25 + $0x20] sm:$0xff] }
  0x9f   : > { %v473_v55 = vpop.permute.xlu0 %472  ;;  %vm437_vm6 = vcmp.ge.s32.totalorder %v2589_v2, 0 }
  0xa0   : > { %vm517_vm7 = vcmp.eq.s32.totalorder %v473_v55, %v2738_v43  ;;  %v724_v56 = vadd.f32 %v2056_v53, %v564_v52  ;;  %v2028_v52 = vsel %vm392_vm12, 1.0, %v2521_v47  ;;  %v1240_v53 = vld [vmem:[%s3444_s4 + $0x10] sm:$0xff] }
  0xa1   : > { %v2041_v58 = vsel %vm517_vm7, 1.0, %v2521_v47  ;;  %2498 = vset.pattern.permute.xlu1 %v2517_v0  ;;  %v2763_v59 = vpop.permute.xlu1 %638  ;;  %2312 = vmatprep.subr.mxu1 %v1240_v53 }
  0xa2   : > { %v565_v60 = vadd.f32 %v2041_v58, %v2025_v54  ;;  %979 = vperm.xlu1 %2498, %v2718_v34   ;;  %v884_v61 = vadd.f32 %v2072_v57, %v724_v56  ;;  %v2027_v57 = vsel %vm391_vm0, 1.0, %v2521_v47  ;;  %2313 = vmatpush3.msra.mxu1 %v1240_v53  ;;  %vm679_vm7 = vcmp.eq.s32.totalorder %v2763_v59, %v2738_v43 }
  0xa3   : > { %v2769_v63 = vpop.permute.xlu0 %475 }
  0xa4   : > { %v725_v6 = vadd.f32 %v2057_v62, %v565_v60  ;;  %v1044_v8 = vadd.f32 %v2088_v5, %v884_v61  ;;  %vm518_vm14 = vcmp.eq.s32.totalorder %v2769_v63, %v2738_v43  ;;  %v1239_v60 = vld [vmem:[%s3444_s4 + $0x8] sm:$0xff]  ;;  %v2862_v61 = vsel %vm439_vm4, 1, %v2520_v14 }
  0xa5   : > { %v2042_v54 = vsel %vm518_vm14, 1.0, %v2521_v47  ;;  %v2029_v62 = vsel %vm393_vm2, 1.0, %v2521_v47  ;;  %2314 = vmatprep.subr.mxu1 %v1239_v60 }
  0xa6   : > { %982 = vperm.xlu1 %2498, %v2663_v29   ;;  %2288 = vmatprep.mubr.f32.mxu0 %v1044_v8  ;;  %v482_v13 = vpop.permute.xlu1 %481  ;;  %v885_v15 = vadd.f32 %v2073_v12, %v725_v6  ;;  %v566_v63 = vadd.f32 %v2042_v54, %v2026_v51  ;;  %v1238_v6 = vld [vmem:[%s3444_s4] sm:$0xff]  ;;  %v1224_v12 = vld [vmem:[%s2884_s25 + $0x10] sm:$0xff]  ;;  %v2983_v29 = vsel %vm447_vm3, 1, %v2520_v14  ;;  %vm443_vm3 = vcmp.ge.s32.totalorder %v2610_v7, 0 }
  0xa7   : > { %v479_v16 = vpop.permute.xlu0 %478  ;;  %vm520_vm15 = vcmp.eq.s32.totalorder %v482_v13, %v2738_v43  ;;  %2315 = vmatpush3.msra.mxu1 %v1239_v60  ;;  %v1222_v8 = vld [vmem:[%s2884_s25] sm:$0xff] }
  0xa8   : > { %v1045_v18 = vadd.f32 %v2089_v11, %v885_v15  ;;  %vm519_vm1 = vcmp.eq.s32.totalorder %v479_v16, %v2738_v43  ;;  %v2044_v55 = vsel %vm520_vm15, 1.0, %v2521_v47  ;;  %2316 = vmatprep.subr.mxu1 %v1238_v6  ;;  %v1223_v11 = vld [vmem:[%s2884_s25 + $0x8] sm:$0xff]  ;;  %v2906_v16 = vsel %vm437_vm6, 1, %v2520_v14  ;;  %2318 = vmatprep.mubr.msk.f32.mxu1 %vm1241_vm9, %v1222_v8 }
  0xa9   : > { %v2043_v58 = vsel %vm519_vm1, 1.0, %v2521_v47  ;;  %v568_v5 = vadd.f32 %v2044_v55, %v2028_v52  ;;  %2317 = vmatpush3.msra.mxu1 %v1238_v6 }
  0xaa   : > { %2499 = vset.pattern.permute.xlu1 %v2520_v14  ;;  %2289 = vmatmul.mubr.f32.vlgmr.msra.gmra.mxu0 %v1045_v18  ;;  %v567_v38 = vadd.f32 %v2043_v58, %v2027_v57  ;;  %v2059_v18 = vsel %vm679_vm7, 1.0, %v2521_v47  ;;  %vm441_vm7 = vcmp.ge.s32.totalorder %v2649_v24, 0 }
  0xab   : > { %511 = vperm.xlu1 %2499, %v2703_v33   ;;  %v2777_v19 = vpop.permute.xlu1 %795  ;;  %v2779_v20 = vpop.permute.xlu0 %484  ;;  %2319 = vmatmul.mubr.msk.f32.vlgmr.msra.gmra.mxu1 %vm1241_vm9, %v1223_v11  ;;  %v3018_v24 = vsel %vm441_vm7, 1, %v2520_v14 }
  0xac   : > { %vm521_vm5 = vcmp.eq.s32.totalorder %v2779_v20, %v2738_v43  ;;  %vm838_vm11 = vcmp.eq.s32.totalorder %v2777_v19, %v2738_v43  ;;  %2321 = vmatprep.mubr.msk.f32.mxu1 %vm1241_vm9, %v1224_v12  ;;  %v2932_v20 = vsel %vm440_vm10, 1, %v2520_v14  ;;  %v727_v51 = vadd.f32 %v2059_v18, %v567_v38  ;;  %v1229_v12 = vld [vmem:[%s2884_s25 + $0x38] sm:$0xff] }
  0xad   : > { %v2045_v13 = vsel %vm521_vm5, 1.0, %v2521_v47  ;;  %v2074_v21 = vsel %vm838_vm11, 1.0, %v2521_v47  ;;  %v378_v38 = vadd.s32 48, %v2736_v42 }
  0xae   : > { %v569_v46 = vadd.f32 %v2045_v13, %v2029_v62  ;;  %v1227_v62 = vld [vmem:[%s2884_s25 + $0x28] sm:$0xff]  ;;  %v1230_v13 = vld [vmem:[%s2884_s25 + $0x40] sm:$0xff] }
  0xaf   : > { %514 = vperm.xlu1 %2499, %v2782_v22   ;;  %v2785_v23 = vpop.permute.xlu1 %798  ;;  %v2787_v25 = vpop.permute.xlu0 %487  ;;  %2322 = vmatmul.mubr.msk.f32.gmra.mxu1 %vm1241_vm9, %v1225_v45  ;;  %vm394_vm5 = vcmp.eq.s32.totalorder %v378_v38, %v2738_v43  ;;  %v1232_v45 = vld [vmem:[%s2884_s25 + $0x50] sm:$0xff]  ;;  %v3070_v38 = vsel %vm443_vm3, 1, %v2520_v14 }
  0xb0   : > { %vm839_vm12 = vcmp.eq.s32.totalorder %v2785_v23, %v2738_v43  ;;  %2324 = vmatprep.mubr.msk.f32.mxu1 %vm1241_vm9, %v1226_v49  ;;  %vm522_vm6 = vcmp.eq.s32.totalorder %v2787_v25, %v2738_v43 }
  0xb3   : > { %2501 = vset.pattern.permute.xlu1 %v2519_v9  ;;  %v2790_v26 = vpop.permute.xlu0 %502  ;;  %2325 = vmatmul.mubr.msk.f32.gmra.mxu1 %vm1241_vm9, %v1227_v62  ;;  %v1237_v62 = vld [vmem:[%s2884_s25 + $0x78] sm:$0xff] }
  0xb4   : > { %828 = vperm.xlu1 %2501, %v2694_v31   ;;  %v2793_v28 = vpop.permute.xlu1 %641 }
  0xb5   : > { %vm680_vm8 = vcmp.eq.s32.totalorder %v2793_v28, %v2738_v43  ;;  %v2075_v28 = vsel %vm839_vm12, 1.0, %v2521_v47 }
  0xb6   : > { %v2060_v2 = vsel %vm680_vm8, 1.0, %v2521_v47 }
  0xb7   : > { %v2795_v35 = vpop.permute.xlu0 %505  ;;  %v728_v54 = vadd.f32 %v2060_v2, %v568_v5  ;;  %v1231_v2 = vld [vmem:[%s2884_s25 + $0x48] sm:$0xff] }
  0xb8   : > { %2502 = vset.pattern.permute.xlu1 %v2517_v0  ;;  %v2798_v36 = vpop.permute.xlu1 %644 }
  0xb9   : > { %985 = vperm.xlu1 %2502, %v2669_v30  }
  0xbc   : > { %v2801_v37 = vpop.permute.xlu0 %804 }
  0xbd   : > { %2503 = vset.pattern.permute.xlu1 %v2518_v1  ;;  %v2805_v39 = vpop.permute.xlu1 %958  ;;  %vm841_vm1 = vcmp.eq.s32.totalorder %v2801_v37, %v2738_v43 }
  0xbe   : > { %674 = vperm.xlu1 %2503, %v2782_v22   ;;  %vm999_vm0 = vcmp.eq.s32.totalorder %v2805_v39, %v2738_v43 }
  0xbf   : > { %v2091_v19 = vsel %vm999_vm0, 1.0, %v2521_v47  ;;  %vm1003_vm0 = vcmp.eq.s32.totalorder %v2733_v40, %v2738_v43  ;;  %v380_v40 = vadd.s32 64, %v2736_v42 }
  0xc0   : > { %v2815_v48 = vpop.permute.xlu0 %807 }
  0xc2   : > { %2505 = vset.pattern.permute.xlu1 %v2519_v9  ;;  %v2819_v1 = vpop.permute.xlu1 %801  ;;  %v2834_v9 = vsel %vm438_vm13, 1, %v2520_v14  ;;  %vm681_vm13 = vcmp.eq.s32.totalorder %v2798_v36, %v2738_v43  ;;  %v887_v36 = vadd.f32 %v2075_v28, %v727_v51  ;;  %v2046_v28 = vsel %vm522_vm6, 1.0, %v2521_v47  ;;  %v1234_v51 = vld [vmem:[%s2884_s25 + $0x60] sm:$0xff] }
  0xc3   : > { %831 = vperm.xlu1 %2505, %v2703_v33   ;;  %584 = vrot.lane.b32.xlu0 %v2834_v9, %s2522_s15  ;;  %vm840_vm14 = vcmp.eq.s32.totalorder %v2819_v1, %v2738_v43  ;;  %v2061_v23 = vsel %vm681_vm13, 1.0, %v2521_v47  ;;  %v2077_v1 = vsel %vm841_vm1, 1.0, %v2521_v47  ;;  %vm442_vm13 = vcmp.ge.s32.totalorder %v2657_v27, 0 }
  0xc4   : > { %v2827_v50 = vpop.permute.xlu0 %822  ;;  %v2076_v52 = vsel %vm840_vm14, 1.0, %v2521_v47  ;;  %v729_v39 = vadd.f32 %v2061_v23, %v569_v46  ;;  %v2030_v46 = vsel %vm394_vm5, 1.0, %v2521_v47  ;;  %vm842_vm14 = vcmp.eq.s32.totalorder %v2815_v48, %v2738_v43 }
  0xc5   : > { %v888_v58 = vadd.f32 %v2076_v52, %v728_v54  ;;  %v3037_v52 = vsel %vm442_vm13, 1, %v2520_v14  ;;  %v1235_v54 = vld [vmem:[%s2884_s25 + $0x68] sm:$0xff]  ;;  %v2078_v48 = vsel %vm842_vm14, 1.0, %v2521_v47  ;;  %vm1004_vm6 = vcmp.eq.s32.totalorder %v2740_v44, %v2738_v43 }
  0xc6   : > { %v889_v6 = vadd.f32 %v2077_v1, %v729_v39 }
  0xc7   : > { %834 = vperm.xlu1 %2505, %v2782_v22   ;;  %v2844_v4 = vpop.permute.xlu1 %490  ;;  %586 = vrot.lane.b32.xlu0 %v2862_v61, %s2522_s15 }
  0xc8   : > { %v2853_v56 = vpop.permute.xlu0 %825  ;;  %vm523_vm10 = vcmp.eq.s32.totalorder %v2844_v4, %v2738_v43  ;;  %v570_v4 = vadd.f32 %v2046_v28, %v2030_v46  ;;  %v2096_v46 = vsel %vm1004_vm6, 1.0, %v2521_v47  ;;  %v383_v28 = vadd.s32 88, %v2736_v42 }
  0xc9   : > { %vm528_vm6 = vcmp.eq.s32.totalorder %v2795_v35, %v2738_v43 }
  0xcb   : > { %2506 = vset.pattern.permute.xlu1 %v2517_v0  ;;  %744 = vrot.lane.b32.xlu0 %v2834_v9, %s2523_s16 }
  0xcc   : > { %994 = vperm.xlu1 %2506, %v2782_v22   ;;  %v2889_v0 = vpop.permute.xlu1 %647 }
  0xcd   : > { %v636_v15 = vpop.permute.xlu0 %635  ;;  %vm682_vm11 = vcmp.eq.s32.totalorder %v2889_v0, %v2738_v43  ;;  %v2047_v0 = vsel %vm523_vm10, 1.0, %v2521_v47  ;;  %vm448_vm10 = vcmp.ge.s32.totalorder %v2669_v30, 0 }
  0xce   : > { %vm678_vm15 = vcmp.eq.s32.totalorder %v636_v15, %v2738_v43  ;;  %v379_v15 = vadd.s32 56, %v2736_v42  ;;  %v3110_v30 = vsel %vm448_vm10, 1, %v2520_v14 }
  0xcf   : > { %v2058_v59 = vsel %vm678_vm15, 1.0, %v2521_v47  ;;  %588 = vrot.lane.b32.xlu0 %v2932_v20, %s2522_s15 }
  0xd0   : > { %v726_v3 = vadd.f32 %v2058_v59, %v566_v63  ;;  %582 = vrot.lane.b32.xlu1 %v2906_v16, %s2522_s15  ;;  %v1047_v63 = vadd.f32 %v2091_v19, %v887_v36  ;;  %vm395_vm8 = vcmp.eq.s32.totalorder %v379_v15, %v2738_v43  ;;  %v1236_v36 = vld [vmem:[%s2884_s25 + $0x70] sm:$0xff] }
  0xd1   : > { %v962_v53 = vpop.permute.xlu1 %961  ;;  %2508 = vset.pattern.permute.xlu1 %v2520_v14  ;;  %v651_v59 = vpop.permute.xlu0 %650  ;;  %v2031_v49 = vsel %vm395_vm8, 1.0, %v2521_v47  ;;  %vm444_vm8 = vcmp.ge.s32.totalorder %v2617_v10, 0  ;;  %v381_v10 = vadd.s32 72, %v2736_v42 }
  0xd2   : > { %v886_v55 = vadd.f32 %v2074_v21, %v726_v3  ;;  %vm1000_vm2 = vcmp.eq.s32.totalorder %v962_v53, %v2738_v43  ;;  %vm683_vm12 = vcmp.eq.s32.totalorder %v651_v59, %v2738_v43  ;;  %v1233_v3 = vld [vmem:[%s2884_s25 + $0x58] sm:$0xff]  ;;  %v2062_v21 = vsel %vm682_vm11, 1.0, %v2521_v47 }
  0xd3   : > { %v2092_v57 = vsel %vm1000_vm2, 1.0, %v2521_v47  ;;  %904 = vrot.lane.b32.xlu0 %v2834_v9, %s2524_s26  ;;  %v2063_v27 = vsel %vm683_vm12, 1.0, %v2521_v47  ;;  %v571_v53 = vadd.f32 %v2047_v0, %v2031_v49  ;;  %v730_v19 = vadd.f32 %v2062_v21, %v570_v4 }
  0xd4   : > { %v1046_v60 = vadd.f32 %v2090_v17, %v886_v55  ;;  %742 = vrot.lane.b32.xlu1 %v2906_v16, %s2523_s16  ;;  %v1048_v37 = vadd.f32 %v2092_v57, %v888_v58  ;;  %v1228_v17 = vld [vmem:[%s2884_s25 + $0x30] sm:$0xff]  ;;  %v2095_v58 = vsel %vm1003_vm0, 1.0, %v2521_v47  ;;  %vm446_vm2 = vcmp.ge.s32.totalorder %v2718_v34, 0  ;;  %v1221_v34 = vld [vmem:[%s3443_s3] sm:$0xff] }
  0xd5   : > { %v965_v5 = vpop.permute.xlu1 %964  ;;  %2327 = vmatprep.mubr.msk.f32.mxu1 %vm1241_vm9, %v1228_v17  ;;  %v731_v1 = vadd.f32 %v2063_v27, %v571_v53  ;;  %2342 = vmatprep.subr.mxu1 %v1221_v34  ;;  %v3104_v44 = vsel %vm444_vm8, 1, %v2520_v14  ;;  %vm399_vm11 = vcmp.eq.s32.totalorder %v383_v28, %v2738_v43  ;;  %vm527_vm12 = vcmp.eq.s32.totalorder %v2790_v26, %v2738_v43 }
  0xd6   : > { %vm1001_vm4 = vcmp.eq.s32.totalorder %v965_v5, %v2738_v43  ;;  %2291 = vmatprep.mubr.f32.mxu0 %v1046_v60  ;;  %2328 = vmatmul.mubr.msk.f32.gmra.mxu1 %vm1241_vm9, %v1229_v12  ;;  %v890_v60 = vadd.f32 %v2078_v48, %v730_v19  ;;  %v3060_v5 = vsel %vm446_vm2, 1, %v2520_v14  ;;  %vm397_vm13 = vcmp.eq.s32.totalorder %v381_v10, %v2738_v43 }
  0xd7   : > { %v2093_v8 = vsel %vm1001_vm4, 1.0, %v2521_v47  ;;  %2292 = vmatmul.mubr.f32.gmra.mxu0 %v1047_v63  ;;  %602 = vrot.lane.b32.xlu0 %v2983_v29, %s2522_s15  ;;  %vm396_vm4 = vcmp.eq.s32.totalorder %v380_v40, %v2738_v43  ;;  %vm449_vm0 = vcmp.ge.s32.totalorder %v2694_v31, 0  ;;  %v2035_v0 = vsel %vm399_vm11, 1.0, %v2521_v47 }
  0xd8   : > { %v1049_v11 = vadd.f32 %v2093_v8, %v889_v6  ;;  %2294 = vmatprep.mubr.f32.mxu0 %v1048_v37  ;;  %900 = vrot.lane.b32.xlu1 %v2808_v41, %s2524_s26  ;;  %v654_v8 = vpop.permute.xlu0 %653  ;;  %v2032_v7 = vsel %vm396_vm4, 1.0, %v2521_v47  ;;  %vm847_vm2 = vcmp.eq.s32.totalorder %v2827_v50, %v2738_v43  ;;  %v2033_v26 = vsel %vm397_vm13, 1.0, %v2521_v47 }
  0xd9   : > { %2330 = vmatprep.mubr.msk.f32.mxu1 %vm1241_vm9, %v1230_v13  ;;  %2343 = vmatpush3.msra.mxu1 %v1221_v34  ;;  %vm684_vm5 = vcmp.eq.s32.totalorder %v654_v8, %v2738_v43  ;;  %v3140_v21 = vsel %vm449_vm0, 1, %v2520_v14  ;;  %v2083_v50 = vsel %vm847_vm2, 1.0, %v2521_v47  ;;  %v382_v40 = vadd.s32 80, %v2736_v42 }
  0xda   : > { %v2991_v18 = vpop.permute.xlu1 %493  ;;  %2331 = vmatmul.mubr.msk.f32.gmra.mxu1 %vm1241_vm9, %v1231_v2  ;;  %v2064_v15 = vsel %vm684_vm5, 1.0, %v2521_v47  ;;  %v2052_v34 = vsel %vm528_vm6, 1.0, %v2521_v47  ;;  %vm848_vm11 = vcmp.eq.s32.totalorder %v2853_v56, %v2738_v43  ;;  %vm451_vm0 = vcmp.ge.s32.totalorder %v2782_v22, 0 }
  0xdb   : > { %2295 = vmatmul.mubr.f32.gmra.mxu0 %v1049_v11  ;;  %748 = vrot.lane.b32.xlu0 %v2932_v20, %s2523_s16  ;;  %v3202_v10 = vsel %vm451_vm0, 1, %v2520_v14 }
  0xdc   : > { %902 = vrot.lane.b32.xlu1 %v2906_v16, %s2524_s26  ;;  %2333 = vmatprep.mubr.msk.f32.mxu1 %vm1241_vm9, %v1232_v45  ;;  %v669_v28 = vpop.permute.xlu0 %668 }
  0xde   : > { %v3010_v25 = vpop.permute.xlu1 %496  ;;  %2334 = vmatmul.mubr.msk.f32.gmra.mxu1 %vm1241_vm9, %v1233_v3 }
  0xdf   : > { %750 = vrot.lane.b32.xlu0 %v3018_v24, %s2523_s16  ;;  %2336 = vmatprep.mubr.msk.f32.mxu1 %vm1241_vm9, %v1234_v51  ;;  %vm525_vm14 = vcmp.eq.s32.totalorder %v3010_v25, %v2738_v43  ;;  %v2051_v51 = vsel %vm527_vm12, 1.0, %v2521_v47 }
  0xe0   : > { %746 = vrot.lane.b32.xlu1 %v2862_v61, %s2523_s16  ;;  %v2049_v25 = vsel %vm525_vm14, 1.0, %v2521_v47  ;;  %v575_v27 = vadd.f32 %v2051_v51, %v2035_v0  ;;  %vm450_vm14 = vcmp.ge.s32.totalorder %v2703_v33, 0  ;;  %v385_v0 = vadd.s32 104, %v2736_v42 }
  0xe1   : > { %v573_v53 = vadd.f32 %v2049_v25, %v2033_v26  ;;  %v3189_v56 = vsel %vm450_vm14, 1, %v2520_v14  ;;  %v672_v26 = vpop.permute.xlu0 %671 }
  0xe2   : > { %2337 = vmatmul.mubr.msk.f32.gmra.mxu1 %vm1241_vm9, %v1235_v54  ;;  %vm401_vm2 = vcmp.eq.s32.totalorder %v385_v0, %v2738_v43 }
  0xe3   : > { %v811_v23 = vpop.permute.xlu1 %810  ;;  %592 = vrot.lane.b32.xlu0 %v3037_v52, %s2522_s15  ;;  %2339 = vmatprep.mubr.msk.f32.mxu1 %vm1241_vm9, %v1236_v36 }
  0xe4   : > { %vm843_vm15 = vcmp.eq.s32.totalorder %v811_v23, %v2738_v43  ;;  %600 = vrot.lane.b32.xlu1 %v3060_v5, %s2522_s15 }
  0xe5   : > { %v2079_v55 = vsel %vm843_vm15, 1.0, %v2521_v47  ;;  %vm445_vm15 = vcmp.ge.s32.totalorder %v2700_v32, 0 }
  0xe6   : > { %v891_v57 = vadd.f32 %v2079_v55, %v731_v1  ;;  %2340 = vmatmul.mubr.msk.f32.gmra.mxu1 %vm1241_vm9, %v1237_v62  ;;  %vm524_vm9 = vcmp.eq.s32.totalorder %v2991_v18, %v2738_v43  ;;  %v3134_v32 = vsel %vm445_vm15, 1, %v2520_v14  ;;  %v384_v62 = vadd.s32 96, %v2736_v42  ;;  %v989_v14 = vpop.permute.xlu0 %988 }
  0xe7   : > { %908 = vrot.lane.b32.xlu0 %v2932_v20, %s2524_s26  ;;  %v2048_v11 = vsel %vm524_vm9, 1.0, %v2521_v47 }
  0xe8   : > { %v968_v39 = vpop.permute.xlu1 %967  ;;  %v1051_v37 = vadd.f32 %v2095_v58, %v891_v57  ;;  %590 = vrot.lane.b32.xlu1 %v3018_v24, %s2522_s15  ;;  %v572_v13 = vadd.f32 %v2048_v11, %v2032_v7  ;;  %vm400_vm5 = vcmp.eq.s32.totalorder %v384_v62, %v2738_v43  ;;  %v2084_v11 = vsel %vm848_vm11, 1.0, %v2521_v47 }
  0xe9   : > { %vm1002_vm1 = vcmp.eq.s32.totalorder %v968_v39, %v2738_v43 }
  0xea   : > { %v2094_v63 = vsel %vm1002_vm1, 1.0, %v2521_v47  ;;  %v732_v2 = vadd.f32 %v2064_v15, %v572_v13 }
  0xeb   : > { %v1050_v6 = vadd.f32 %v2094_v63, %v890_v60  ;;  %594 = vrot.lane.b32.xlu0 %v3070_v38, %s2522_s15 }
  0xec   : > { %906 = vrot.lane.b32.xlu1 %v2862_v61, %s2524_s26 }
  0xed   : > { %v657_v17 = vpop.permute.xlu1 %656  ;;  %2297 = vmatprep.mubr.f32.mxu0 %v1050_v6  ;;  %v2036_v6 = vsel %vm400_vm5, 1.0, %v2521_v47  ;;  %vm1009_vm5 = vcmp.eq.s32.totalorder %v989_v14, %v2738_v43 }
  0xee   : > { %2298 = vmatmul.mubr.f32.gmra.mxu0 %v1051_v37  ;;  %vm685_vm1 = vcmp.eq.s32.totalorder %v657_v17, %v2738_v43  ;;  %v576_v8 = vadd.f32 %v2052_v34, %v2036_v6 }
  0xef   : > { %910 = vrot.lane.b32.xlu0 %v3018_v24, %s2524_s26  ;;  %v2065_v23 = vsel %vm685_vm1, 1.0, %v2521_v47 }
  0xf0   : > { %760 = vrot.lane.b32.xlu1 %v3060_v5, %s2523_s16  ;;  %v733_v36 = vadd.f32 %v2065_v23, %v573_v53  ;;  %v992_v23 = vpop.permute.xlu0 %991 }
  0xf1   : > { %vm1010_vm11 = vcmp.eq.s32.totalorder %v992_v23, %v2738_v43 }
  0xf2   : > { %v3082_v12 = vpop.permute.xlu1 %499 }
  0xf3   : > { %752 = vrot.lane.b32.xlu0 %v3037_v52, %s2523_s16  ;;  %vm526_vm8 = vcmp.eq.s32.totalorder %v3082_v12, %v2738_v43 }
  0xf4   : > { %762 = vrot.lane.b32.xlu1 %v2983_v29, %s2523_s16  ;;  %v2050_v37 = vsel %vm526_vm8, 1.0, %v2521_v47 }
  0xf7   : > { %v814_v18 = vpop.permute.xlu1 %813  ;;  %754 = vrot.lane.b32.xlu0 %v3070_v38, %s2523_s16 }
  0xf8   : > { %vm844_vm7 = vcmp.eq.s32.totalorder %v814_v18, %v2738_v43  ;;  %604 = vrot.lane.b32.xlu1 %v3110_v30, %s2522_s15 }
  0xf9   : > { %v2080_v59 = vsel %vm844_vm7, 1.0, %v2521_v47  ;;  %vm398_vm7 = vcmp.eq.s32.totalorder %v382_v40, %v2738_v43 }
  0xfa   : > { %v892_v45 = vadd.f32 %v2080_v59, %v732_v2  ;;  %v2034_v35 = vsel %vm398_vm7, 1.0, %v2521_v47 }
  0xfb   : > { %v817_v3 = vpop.permute.xlu1 %816  ;;  %596 = vrot.lane.b32.xlu0 %v3104_v44, %s2522_s15  ;;  %v574_v12 = vadd.f32 %v2050_v37, %v2034_v35  ;;  %v387_v37 = vadd.s32 120, %v2736_v42 }
  0xfc   : > { %v1052_v4 = vadd.f32 %v2096_v46, %v892_v45  ;;  %920 = vrot.lane.b32.xlu1 %v3060_v5, %s2524_s26  ;;  %vm845_vm3 = vcmp.eq.s32.totalorder %v817_v3, %v2738_v43 }
  0xfd   : > { %v2081_v19 = vsel %vm845_vm3, 1.0, %v2521_v47 }
  0xfe   : > { %2300 = vmatprep.mubr.f32.mxu0 %v1052_v4  ;;  %v893_v57 = vadd.f32 %v2081_v19, %v733_v36 }
  0xff   : > { %912 = vrot.lane.b32.xlu0 %v3037_v52, %s2524_s26 }
 0x100   : > { %v660_v49 = vpop.permute.xlu1 %659  ;;  %606 = vrot.lane.b32.xlu1 %v3140_v21, %s2522_s15 }
 0x101   : > { %vm686_vm10 = vcmp.eq.s32.totalorder %v660_v49, %v2738_v43 }
 0x102   : > { %v2066_v7 = vsel %vm686_vm10, 1.0, %v2521_v47  ;;  %vm690_vm10 = vcmp.eq.s32.totalorder %v672_v26, %v2738_v43 }
 0x103   : > { %598 = vrot.lane.b32.xlu0 %v3134_v32, %s2522_s15  ;;  %v734_v2 = vadd.f32 %v2066_v7, %v574_v12 }
 0x104   : > { %v663_v31 = vpop.permute.xlu1 %662  ;;  %922 = vrot.lane.b32.xlu1 %v2983_v29, %s2524_s26 }
 0x105   : > { %vm687_vm4 = vcmp.eq.s32.totalorder %v663_v31, %v2738_v43  ;;  %v2037_v31 = vsel %vm401_vm2, 1.0, %v2521_v47  ;;  %vm1435_vm2 = vcmask 64512  }
 0x106   : > { %v2067_v54 = vsel %vm687_vm4, 1.0, %v2521_v47  ;;  %vm689_vm4 = vcmp.eq.s32.totalorder %v669_v28, %v2738_v43 }
 0x107   : > { %v735_v55 = vadd.f32 %v2067_v54, %v575_v27  ;;  %914 = vrot.lane.b32.xlu0 %v3070_v38, %s2524_s26  ;;  %v2069_v53 = vsel %vm689_vm4, 1.0, %v2521_v47  ;;  %v581_v19 = vpop.permute.xlu0 %580 }
 0x108   : > { %764 = vrot.lane.b32.xlu1 %v3110_v30, %s2523_s16 }
 0x109   : > { %v977_v48 = vpop.permute.xlu1 %976  ;;  %v895_v1 = vadd.f32 %v2083_v50, %v735_v55  ;;  %v386_v55 = vadd.s32 112, %v2736_v42  ;;  %v2102_v42 = vsel %vm1010_vm11, 1.0, %v2521_v47 }
 0x10a   : > { %vm1005_vm9 = vcmp.eq.s32.totalorder %v977_v48, %v2738_v43 }
 0x10b   : > { %v2097_v39 = vsel %vm1005_vm9, 1.0, %v2521_v47  ;;  %756 = vrot.lane.b32.xlu0 %v3104_v44, %s2523_s16  ;;  %vm402_vm6 = vcmp.eq.s32.totalorder %v386_v55, %v2738_v43 }
 0x10c   : > { %v1053_v58 = vadd.f32 %v2097_v39, %v893_v57  ;;  %766 = vrot.lane.b32.xlu1 %v3140_v21, %s2523_s16  ;;  %v741_v39 = vpop.permute.xlu0 %740  ;;  %v2038_v40 = vsel %vm402_vm6, 1.0, %v2521_v47 }
 0x10e   : > { %v820_v60 = vpop.permute.xlu1 %819  ;;  %2301 = vmatmul.mubr.f32.gmra.mxu0 %v1053_v58  ;;  %v2101_v58 = vsel %vm1009_vm5, 1.0, %v2521_v47 }
 0x10f   : > { %758 = vrot.lane.b32.xlu0 %v3134_v32, %s2523_s16  ;;  %vm846_vm12 = vcmp.eq.s32.totalorder %v820_v60, %v2738_v43 }
 0x110   : > { %v2082_v15 = vsel %vm846_vm12, 1.0, %v2521_v47  ;;  %608 = vrot.lane.b32.xlu1 %v3189_v56, %s2522_s15  ;;  %vm403_vm12 = vcmp.eq.s32.totalorder %v387_v37, %v2738_v43 }
 0x111   : > { %v894_v45 = vadd.f32 %v2082_v15, %v734_v2 }
 0x113   : > { %v509_v63 = vpop.permute.xlu1 %508  ;;  %916 = vrot.lane.b32.xlu0 %v3104_v44, %s2524_s26 }
 0x114   : > { %924 = vrot.lane.b32.xlu1 %v3110_v30, %s2524_s26  ;;  %vm529_vm3 = vcmp.eq.s32.totalorder %v509_v63, %v2738_v43 }
 0x115   : > { %v2053_v27 = vsel %vm529_vm3, 1.0, %v2521_v47 }
 0x116   : > { %v577_v50 = vadd.f32 %v2053_v27, %v2037_v31  ;;  %v612_v31 = vadd.s32 %v581_v19, %v2808_v41 }
 0x117   : > { %918 = vrot.lane.b32.xlu0 %v3134_v32, %s2524_s26 }
 0x118   : > { %v666_v17 = vpop.permute.xlu1 %665  ;;  %610 = vrot.lane.b32.xlu1 %v3202_v10, %s2522_s15  ;;  %v737_v48 = vadd.f32 %v2069_v53, %v577_v50  ;;  %v772_v53 = vadd.s32 %v741_v39, %v612_v31 }
 0x119   : > { %vm688_vm13 = vcmp.eq.s32.totalorder %v666_v17, %v2738_v43 }
 0x11a   : > { %v2068_v13 = vsel %vm688_vm13, 1.0, %v2521_v47 }
 0x11b   : > { %v736_v18 = vadd.f32 %v2068_v13, %v576_v8  ;;  %v2070_v8 = vsel %vm690_vm10, 1.0, %v2521_v47 }
 0x11c   : > { %926 = vrot.lane.b32.xlu1 %v3140_v21, %s2524_s26 }
 0x11d   : > { %v980_v59 = vpop.permute.xlu1 %979  ;;  %v896_v33 = vadd.f32 %v2084_v11, %v736_v18  ;;  %v2039_v18 = vsel %vm403_vm12, 1.0, %v2521_v47 }
 0x11e   : > { %vm1006_vm15 = vcmp.eq.s32.totalorder %v980_v59, %v2738_v43 }
 0x11f   : > { %v2098_v46 = vsel %vm1006_vm15, 1.0, %v2521_v47 }
 0x120   : > { %v1054_v3 = vadd.f32 %v2098_v46, %v894_v45  ;;  %768 = vrot.lane.b32.xlu1 %v3189_v56, %s2523_s16 }
 0x121   : > { %v983_v4 = vpop.permute.xlu1 %982 }
 0x122   : > { %vm1007_vm1 = vcmp.eq.s32.totalorder %v983_v4, %v2738_v43  ;;  %2303 = vmatprep.mubr.f32.mxu0 %v1054_v3 }
 0x123   : > { %v2099_v49 = vsel %vm1007_vm1, 1.0, %v2521_v47 }
 0x124   : > { %v1055_v51 = vadd.f32 %v2099_v49, %v895_v1  ;;  %770 = vrot.lane.b32.xlu1 %v3202_v10, %s2523_s16 }
 0x126   : > { %v512_v25 = vpop.permute.xlu1 %511  ;;  %2304 = vmatmul.mubr.f32.gmra.mxu0 %v1055_v51 }
 0x127   : > { %vm530_vm7 = vcmp.eq.s32.totalorder %v512_v25, %v2738_v43 }
 0x128   : > { %928 = vrot.lane.b32.xlu1 %v3189_v56, %s2524_s26  ;;  %v2054_v63 = vsel %vm530_vm7, 1.0, %v2521_v47 }
 0x129   : > { %v578_v17 = vadd.f32 %v2054_v63, %v2038_v40 }
 0x12a   : > { %v515_v22 = vpop.permute.xlu1 %514 }
 0x12b   : > { %vm531_vm13 = vcmp.eq.s32.totalorder %v515_v22, %v2738_v43  ;;  %v738_v12 = vadd.f32 %v2070_v8, %v578_v17 }
 0x12c   : > { %930 = vrot.lane.b32.xlu1 %v3202_v10, %s2524_s26  ;;  %v2055_v2 = vsel %vm531_vm13, 1.0, %v2521_v47 }
 0x12d   : > { %v579_v28 = vadd.f32 %v2055_v2, %v2039_v18 }
 0x12f   : > { %v829_v54 = vpop.permute.xlu1 %828 }
 0x130   : > { %vm849_vm9 = vcmp.eq.s32.totalorder %v829_v54, %v2738_v43 }
 0x131   : > { %v2085_v36 = vsel %vm849_vm9, 1.0, %v2521_v47 }
 0x132   : > { %v897_v1 = vadd.f32 %v2085_v36, %v737_v48 }
 0x134   : > { %v986_v57 = vpop.permute.xlu1 %985  ;;  %v1057_v6 = vadd.f32 %v2101_v58, %v897_v1 }
 0x135   : > { %vm1008_vm8 = vcmp.eq.s32.totalorder %v986_v57, %v2738_v43  ;;  %v585_v34 = vpop.permute.xlu0 %584 }
 0x136   : > { %v2100_v60 = vsel %vm1008_vm8, 1.0, %v2521_v47  ;;  %v614_v55 = vadd.s32 %v585_v34, %v2834_v9 }
 0x137   : > { %v1056_v62 = vadd.f32 %v2100_v60, %v896_v33 }
 0x139   : > { %v675_v35 = vpop.permute.xlu1 %674  ;;  %2306 = vmatprep.mubr.f32.mxu0 %v1056_v62  ;;  %v587_v7 = vpop.permute.xlu0 %586 }
 0x13a   : > { %2307 = vmatmul.mubr.f32.gmra.mxu0 %v1057_v6  ;;  %vm691_vm15 = vcmp.eq.s32.totalorder %v675_v35, %v2738_v43  ;;  %v615_v9 = vadd.s32 %v587_v7, %v2862_v61 }
 0x13b   : > { %v2071_v45 = vsel %vm691_vm15, 1.0, %v2521_v47 }
 0x13c   : > { %v739_v49 = vadd.f32 %v2071_v45, %v579_v28 }
 0x13d   : > { %v745_v15 = vpop.permute.xlu0 %744 }
 0x13e   : > { %v832_v11 = vpop.permute.xlu1 %831  ;;  %v774_v57 = vadd.s32 %v745_v15, %v614_v55 }
 0x13f   : > { %vm850_vm14 = vcmp.eq.s32.totalorder %v832_v11, %v2738_v43 }
 0x140   : > { %v2086_v13 = vsel %vm850_vm14, 1.0, %v2521_v47 }
 0x141   : > { %v898_v59 = vadd.f32 %v2086_v13, %v738_v12  ;;  %v589_v3 = vpop.permute.xlu0 %588 }
 0x142   : > { %v835_v33 = vpop.permute.xlu1 %834 }
 0x143   : > { %v1058_v46 = vadd.f32 %v2102_v42, %v898_v59  ;;  %vm851_vm0 = vcmp.eq.s32.totalorder %v835_v33, %v2738_v43 }
 0x144   : > { %v2087_v4 = vsel %vm851_vm0, 1.0, %v2521_v47 }
 0x145   : > { %2309 = vmatprep.mubr.f32.mxu0 %v1058_v46  ;;  %v899_v51 = vadd.f32 %v2087_v4, %v739_v49  ;;  %v905_v26 = vpop.permute.xlu0 %904 }
 0x146   : > { %v934_v41 = vadd.s32 %v905_v26, %v774_v57 }
 0x147   : > { %v995_v0 = vpop.permute.xlu1 %994 }
 0x148   : > { %vm1011_vm1 = vcmp.eq.s32.totalorder %v995_v0, %v2738_v43 }
 0x149   : > { %v2103_v25 = vsel %vm1011_vm1, 1.0, %v2521_v47  ;;  %v603_v27 = vpop.permute.xlu0 %602  ;;  %v616_v47 = vadd.s32 %v589_v3, %v2932_v20 }
 0x14a   : > { %v1059_v14 = vadd.f32 %v2103_v25, %v899_v51  ;;  %v623_v25 = vadd.s32 %v603_v27, %v2983_v29  ;;  %v1766_v27 = vld [vmem:[%s3447_s7 + $0x68] sm:$0xff] }
 0x14b   : > { %v583_v22 = vpop.permute.xlu1 %582 }
 0x14c   : > { %2310 = vmatmul.mubr.f32.gmra.mxu0 %v1059_v14  ;;  %v613_v50 = vadd.s32 %v583_v22, %v2906_v16 }
 0x14d   : > { %v749_v54 = vpop.permute.xlu0 %748 }
 0x14e   : > { %v776_v19 = vadd.s32 %v749_v54, %v616_v47  ;;  %v1767_v54 = vld [vmem:[%s3447_s7 + $0x70] sm:$0xff] }
 0x14f   : > { %v743_v23 = vpop.permute.xlu1 %742 }
 0x150   : > { %v773_v48 = vadd.s32 %v743_v23, %v613_v50 }
 0x151   : > { %v751_v43 = vpop.permute.xlu0 %750 }
 0x153   : > { %v901_v36 = vpop.permute.xlu1 %900 }
 0x154   : > { %v932_v1 = vadd.s32 %v901_v36, %v772_v53 }
 0x155   : > { %v593_v62 = vpop.permute.xlu0 %592 }
 0x156   : > { %1670 = vperm.xlu0 %2507, %v932_v1   ;;  %v618_v61 = vadd.s32 %v593_v62, %v3037_v52  ;;  %v1765_v1 = vld [vmem:[%s3447_s7 + $0x60] sm:$0xff] }
 0x157   : > { %v903_v58 = vpop.permute.xlu1 %902 }
 0x158   : > { %v933_v60 = vadd.s32 %v903_v58, %v773_v48 }
 0x159   : > { %v909_v16 = vpop.permute.xlu0 %908 }
 0x15a   : > { %1673 = vperm.xlu1 %2508, %v933_v60   ;;  %v936_v39 = vadd.s32 %v909_v16, %v776_v19  ;;  %v1763_v19 = vld [vmem:[%s3447_s7 + $0x50] sm:$0xff] }
 0x15b   : > { %v747_v40 = vpop.permute.xlu1 %746 }
 0x15c   : > { %v775_v35 = vadd.s32 %v747_v40, %v615_v9  ;;  %v1762_v9 = vld [vmem:[%s3447_s7 + $0x48] sm:$0xff] }
 0x15d   : > { %v595_v6 = vpop.permute.xlu0 %594 }
 0x15e   : > { %1676 = vperm.xlu1 %2508, %v934_v41   ;;  %v619_v33 = vadd.s32 %v595_v6, %v3070_v38 }
 0x15f   : > { %v601_v63 = vpop.permute.xlu1 %600 }
 0x160   : > { %v622_v4 = vadd.s32 %v601_v63, %v3060_v5  ;;  %v1768_v5 = vld [vmem:[%s3447_s7 + $0x78] sm:$0xff] }
 0x161   : > { %v911_v20 = vpop.permute.xlu0 %910  ;;  %2368 = vmatprep.subr.mxu0 %v1768_v5  ;;  %2424 = vmatprep.subr.mxu1 %v1768_v5 }
 0x162   : > { %1682 = vperm.xlu1 %2508, %v936_v39   ;;  %2369 = vmatpush3.msra.mxu0 %v1768_v5 }
 0x163   : > { %v591_v34 = vpop.permute.xlu1 %590  ;;  %2370 = vmatprep.subr.mxu0 %v1767_v54 }
 0x164   : > { %v617_v37 = vadd.s32 %v591_v34, %v3018_v24  ;;  %2371 = vmatpush3.msra.mxu0 %v1767_v54 }
 0x165   : > { %v753_v13 = vpop.permute.xlu0 %752  ;;  %2372 = vmatprep.subr.mxu0 %v1766_v27 }
 0x166   : > { %v777_v17 = vadd.s32 %v751_v43, %v617_v37  ;;  %v778_v24 = vadd.s32 %v753_v13, %v618_v61  ;;  %2373 = vmatpush3.msra.mxu0 %v1766_v27  ;;  %v1758_v13 = vld [vmem:[%s3447_s7 + $0x28] sm:$0xff] }
 0x167   : > { %v907_v8 = vpop.permute.xlu1 %906  ;;  %2374 = vmatprep.subr.mxu0 %v1765_v1 }
 0x168   : > { %v937_v11 = vadd.s32 %v911_v20, %v777_v17  ;;  %v935_v12 = vadd.s32 %v907_v8, %v775_v35  ;;  %2375 = vmatpush3.msra.mxu0 %v1765_v1  ;;  %v1760_v17 = vld [vmem:[%s3447_s7 + $0x38] sm:$0xff] }
 0x169   : > { %v755_v18 = vpop.permute.xlu0 %754 }
 0x16a   : > { %v2290_v42 = vpop.f32.mrf.mxu0  ;;  %1679 = vperm.xlu0 %2507, %v935_v12   ;;  %1685 = vperm.xlu1 %2508, %v937_v11   ;;  %v779_v3 = vadd.s32 %v755_v18, %v619_v33  ;;  %v1759_v11 = vld [vmem:[%s3447_s7 + $0x30] sm:$0xff]  ;;  %v1756_v33 = vld [vmem:[%s3447_s7 + $0x18] sm:$0xff] }
 0x16b   : > { %v761_v2 = vpop.permute.xlu1 %760 }
 0x16c   : > { %v1142_v15 = vpop.f32.mrf.mxu0  ;;  %v782_v26 = vadd.s32 %v761_v2, %v622_v4 }
 0x16d   : > { %2344 = vmatprep.mubr.msk.f32.mxu1 %vm1435_vm2, %v1142_v15  ;;  %v597_v7 = vpop.permute.xlu0 %596 }
 0x16e   : > { %2345 = vmatmul.mubr.msk.f32.vlgmr.msra.gmra.mxu1 %vm1435_vm2, %v2290_v42  ;;  %v620_v55 = vadd.s32 %v597_v7, %v3104_v44 }
 0x16f   : > { %v763_v46 = vpop.permute.xlu1 %762  ;;  %2440 = vmatpush3.msra.mxu1 %v1768_v5 }
 0x170   : > { %v783_v31 = vadd.s32 %v763_v46, %v623_v25  ;;  %2425 = vmatprep.subr.mxu1 %v1767_v54  ;;  %v1755_v46 = vld [vmem:[%s3447_s7 + $0x10] sm:$0xff]  ;;  %v2320_v25 = vpop.f32.mrf.mxu1 }
 0x171   : > { %v913_v59 = vpop.permute.xlu0 %912  ;;  %2441 = vmatpush3.msra.mxu1 %v1767_v54 }
 0x172   : > { %v938_v45 = vadd.s32 %v913_v59, %v778_v24  ;;  %2426 = vmatprep.subr.mxu1 %v1766_v27  ;;  %v1757_v24 = vld [vmem:[%s3447_s7 + $0x20] sm:$0xff] }
 0x173   : > { %v605_v51 = vpop.permute.xlu1 %604  ;;  %2442 = vmatpush3.msra.mxu1 %v1766_v27 }
 0x174   : > { %1688 = vperm.xlu1 %2508, %v938_v45   ;;  %v624_v36 = vadd.s32 %v605_v51, %v3110_v30  ;;  %v1764_v30 = vld [vmem:[%s3447_s7 + $0x58] sm:$0xff]  ;;  %2427 = vmatprep.subr.mxu1 %v1765_v1 }
 0x175   : > { %v599_v28 = vpop.permute.xlu0 %598  ;;  %2443 = vmatpush3.msra.mxu1 %v1765_v1  ;;  %2376 = vmatprep.subr.mxu0 %v1764_v30 }
 0x176   : > { %v621_v44 = vadd.s32 %v599_v28, %v3134_v32  ;;  %2428 = vmatprep.subr.mxu1 %v1764_v30  ;;  %2377 = vmatpush3.msra.mxu0 %v1764_v30  ;;  %v1754_v28 = vld [vmem:[%s3447_s7 + $0x8] sm:$0xff] }
 0x177   : > { %v921_v52 = vpop.permute.xlu1 %920  ;;  %2378 = vmatprep.subr.mxu0 %v1763_v19  ;;  %2444 = vmatpush3.msra.mxu1 %v1764_v30 }
 0x178   : > { %v942_v14 = vadd.s32 %v921_v52, %v782_v26  ;;  %2379 = vmatpush3.msra.mxu0 %v1763_v19  ;;  %2429 = vmatprep.subr.mxu1 %v1763_v19 }
 0x179   : > { %v915_v49 = vpop.permute.xlu0 %914  ;;  %2380 = vmatprep.subr.mxu0 %v1762_v9  ;;  %2445 = vmatpush3.msra.mxu1 %v1763_v19 }
 0x17a   : > { %v939_v0 = vadd.s32 %v915_v49, %v779_v3  ;;  %1700 = vperm.xlu0 %2507, %v942_v14   ;;  %2381 = vmatpush3.msra.mxu0 %v1762_v9  ;;  %v1753_v49 = vld [vmem:[%s3447_s7] sm:$0xff]  ;;  %v1356_v14 = vpop.f32.mrf.mxu1 }
 0x17b   : > { %v607_v22 = vpop.permute.xlu1 %606  ;;  %2430 = vmatprep.subr.mxu1 %v1762_v9 }
 0x17c   : > { %1691 = vperm.xlu1 %2508, %v939_v0   ;;  %v625_v39 = vadd.s32 %v607_v22, %v3140_v21  ;;  %v1761_v21 = vld [vmem:[%s3447_s7 + $0x40] sm:$0xff]  ;;  %2446 = vmatpush3.msra.mxu1 %v1762_v9  ;;  %v2323_v22 = vpop.f32.mrf.mxu1 }
 0x17d   : > { %v757_v53 = vpop.permute.xlu0 %756  ;;  %2382 = vmatprep.subr.mxu0 %v1761_v21  ;;  %2431 = vmatprep.subr.mxu1 %v1761_v21 }
 0x17e   : > { %v780_v43 = vadd.s32 %v757_v53, %v620_v55  ;;  %2383 = vmatpush3.msra.mxu0 %v1761_v21  ;;  %2447 = vmatpush3.msra.mxu1 %v1761_v21 }
 0x17f   : > { %v923_v38 = vpop.permute.xlu1 %922  ;;  %2384 = vmatprep.subr.mxu0 %v1760_v17  ;;  %2432 = vmatprep.subr.mxu1 %v1760_v17 }
 0x180   : > { %v943_v23 = vadd.s32 %v923_v38, %v783_v31  ;;  %2385 = vmatpush3.msra.mxu0 %v1760_v17  ;;  %2448 = vmatpush3.msra.mxu1 %v1760_v17  ;;  %v1366_v38 = vpop.f32.mrf.mxu1 }
 0x181   : > { %v759_v48 = vpop.permute.xlu0 %758  ;;  %2386 = vmatprep.subr.mxu0 %v1759_v11  ;;  %2433 = vmatprep.subr.mxu1 %v1759_v11 }
 0x182   : > { %1703 = vperm.xlu0 %2507, %v943_v23   ;;  %v781_v41 = vadd.s32 %v759_v48, %v621_v44  ;;  %2387 = vmatpush3.msra.mxu0 %v1759_v11 }
 0x183   : > { %v765_v50 = vpop.permute.xlu1 %764  ;;  %2388 = vmatprep.subr.mxu0 %v1758_v13  ;;  %2449 = vmatpush3.msra.mxu1 %v1759_v11 }
 0x184   : > { %v784_v58 = vadd.s32 %v765_v50, %v624_v36  ;;  %2389 = vmatpush3.msra.mxu0 %v1758_v13  ;;  %2434 = vmatprep.subr.mxu1 %v1758_v13  ;;  %v2326_v50 = vpop.f32.mrf.mxu1 }
 0x185   : > { %v917_v60 = vpop.permute.xlu0 %916  ;;  %2450 = vmatpush3.msra.mxu1 %v1758_v13  ;;  %2390 = vmatprep.subr.mxu0 %v1757_v24 }
 0x186   : > { %v940_v32 = vadd.s32 %v917_v60, %v780_v43  ;;  %2435 = vmatprep.subr.mxu1 %v1757_v24  ;;  %2391 = vmatpush3.msra.mxu0 %v1757_v24  ;;  %v1376_v53 = vpop.f32.mrf.mxu1  ;;  %v3352_v60 = vld [vmem:[%s3445_s5] ss:$0 sm:$0xff] }
 0x187   : > { %v767_v29 = vpop.permute.xlu1 %766  ;;  %2451 = vmatpush3.msra.mxu1 %v1757_v24  ;;  %2392 = vmatprep.subr.mxu0 %v1756_v33 }
 0x188   : > { %1694 = vperm.xlu1 %2508, %v940_v32   ;;  %v785_v20 = vadd.s32 %v767_v29, %v625_v39  ;;  %2436 = vmatprep.subr.mxu1 %v1756_v33  ;;  %v3357_v32 = vld [vmem:[%s3446_s6] ss:$0 sm:$0xff] }
 0x189   : > { %v919_v6 = vpop.permute.xlu0 %918  ;;  %2393 = vmatpush3.msra.mxu0 %v1756_v33  ;;  %2452 = vmatpush3.msra.mxu1 %v1756_v33 }
 0x18a   : > { %v941_v35 = vadd.s32 %v919_v6, %v781_v41  ;;  %2394 = vmatprep.subr.mxu0 %v1755_v46  ;;  %2437 = vmatprep.subr.mxu1 %v1755_v46 }
 0x18b   : > { %v609_v57 = vpop.permute.xlu1 %608  ;;  %2395 = vmatpush3.msra.mxu0 %v1755_v46  ;;  %2453 = vmatpush3.msra.mxu1 %v1755_v46 }
 0x18c   : > { %1697 = vperm.xlu1 %2508, %v941_v35   ;;  %v626_v15 = vadd.s32 %v609_v57, %v3189_v56  ;;  %2396 = vmatprep.subr.mxu0 %v1754_v28 }
 0x18d   : > { %2397 = vmatpush3.msra.mxu0 %v1754_v28  ;;  %2438 = vmatprep.subr.mxu1 %v1754_v28 }
 0x18e   : > { %2398 = vmatprep.subr.mxu0 %v1753_v49  ;;  %2454 = vmatpush3.msra.mxu1 %v1754_v28 }
 0x18f   : > { %v925_v40 = vpop.permute.xlu1 %924  ;;  %2399 = vmatpush3.msra.mxu0 %v1753_v49  ;;  %2439 = vmatprep.subr.mxu1 %v1753_v49 }
 0x190   : > { %v944_v63 = vadd.s32 %v925_v40, %v784_v58  ;;  %2455 = vmatpush3.msra.mxu1 %v1753_v49 }
 0x192   : > { %1706 = vperm.xlu0 %2507, %v944_v63  }
 0x193   : > { %v611_v37 = vpop.permute.xlu1 %610 }
 0x194   : > { %v627_v7 = vadd.s32 %v611_v37, %v3202_v10 }
 0x196   : > { %v2329_v5 = vpop.f32.mrf.mxu1 }
 0x197   : > { %v2293_v47 = vpop.f32.mrf.mxu0  ;;  %v927_v8 = vpop.permute.xlu1 %926 }
 0x198   : > { %v945_v12 = vadd.s32 %v927_v8, %v785_v20  ;;  %v1386_v54 = vpop.f32.mrf.mxu1 }
 0x199   : > { %v1152_v62 = vpop.f32.mrf.mxu0 }
 0x19a   : > { %2347 = vmatprep.mubr.msk.f32.mxu1 %vm1435_vm2, %v1152_v62  ;;  %1709 = vperm.xlu0 %2507, %v945_v12   ;;  %v3331_v27 = vpop.f32.mrf.mxu1 }
 0x19b   : > { %v2296_v16 = vpop.f32.mrf.mxu0  ;;  %2348 = vmatmul.mubr.msk.f32.gmra.mxu1 %vm1435_vm2, %v2293_v47  ;;  %v769_v42 = vpop.permute.xlu1 %768 }
 0x19c   : > { %v786_v61 = vadd.s32 %v769_v42, %v626_v15  ;;  %v3335_v36 = vpop.f32.mrf.mxu1 }
 0x19d   : > { %v1162_v34 = vpop.f32.mrf.mxu0 }
 0x19e   : > { %2350 = vmatprep.mubr.msk.f32.mxu1 %vm1435_vm2, %v1162_v34  ;;  %v3337_v48 = vpop.f32.mrf.mxu1 }
 0x19f   : > { %2351 = vmatmul.mubr.msk.f32.gmra.mxu1 %vm1435_vm2, %v2296_v16  ;;  %v771_v18 = vpop.permute.xlu1 %770 }
 0x1a0   : > { %v787_v10 = vadd.s32 %v771_v18, %v627_v7  ;;  %v3339_v1 = vpop.f32.mrf.mxu1 }
 0x1a2   : > { %v3341_v44 = vpop.f32.mrf.mxu1 }
 0x1a3   : > { %v929_v59 = vpop.permute.xlu1 %928 }
 0x1a4   : > { %v946_v56 = vadd.s32 %v929_v59, %v786_v61  ;;  %v3343_v43 = vpop.f32.mrf.mxu1 }
 0x1a6   : > { %1712 = vperm.xlu0 %2507, %v946_v56   ;;  %v3345_v57 = vpop.f32.mrf.mxu1 }
 0x1a7   : > { %v931_v3 = vpop.permute.xlu1 %930 }
 0x1a8   : > { %v947_v4 = vadd.s32 %v931_v3, %v787_v10  ;;  %v3347_v30 = vpop.f32.mrf.mxu1 }
 0x1aa   : > { %1715 = vperm.xlu0 %2507, %v947_v4  }
 0x1ae   : > { %v2299_v2 = vpop.f32.mrf.mxu0 }
 0x1b0   : > { %v1172_v45 = vpop.f32.mrf.mxu0 }
 0x1b1   : > { %2353 = vmatprep.mubr.msk.f32.mxu1 %vm1435_vm2, %v1172_v45 }
 0x1b2   : > { %2354 = vmatmul.mubr.msk.f32.gmra.mxu1 %vm1435_vm2, %v2299_v2 }
 0x1ce   : > { %v2302_v0 = vpop.f32.mrf.mxu0 }
 0x1d0   : > { %v1182_v51 = vpop.f32.mrf.mxu0 }
 0x1d1   : > { %2356 = vmatprep.mubr.msk.f32.mxu1 %vm1435_vm2, %v1182_v51  ;;  %v1671_v19 = vpop.permute.xlu0 %1670 }
 0x1d2   : > { %2357 = vmatmul.mubr.msk.f32.gmra.mxu1 %vm1435_vm2, %v2302_v0  ;;  %vm1721_vm3 = vcmp.eq.s32.totalorder %v1671_v19, %v3357_v32 }
 0x1d5   : > { %v1674_v16 = vpop.permute.xlu1 %1673 }
 0x1d6   : > { %vm1722_vm4 = vcmp.eq.s32.totalorder %v1674_v16, %v3357_v32 }
 0x1d9   : > { %v1677_v6 = vpop.permute.xlu1 %1676 }
 0x1da   : > { %vm1723_vm9 = vcmp.eq.s32.totalorder %v1677_v6, %v3357_v32 }
 0x1dd   : > { %v1683_v21 = vpop.permute.xlu1 %1682 }
 0x1de   : > { %vm1725_vm6 = vcmp.eq.s32.totalorder %v1683_v21, %v3357_v32 }
 0x1e5   : > { %v1680_v11 = vpop.permute.xlu0 %1679  ;;  %v1686_v24 = vpop.permute.xlu1 %1685 }
 0x1e6   : > { %v2305_v26 = vpop.f32.mrf.mxu0  ;;  %vm1724_vm5 = vcmp.eq.s32.totalorder %v1680_v11, %v3357_v32  ;;  %vm1726_vm7 = vcmp.eq.s32.totalorder %v1686_v24, %v3357_v32 }
 0x1e8   : > { %v1192_v52 = vpop.f32.mrf.mxu0 }
 0x1e9   : > { %2359 = vmatprep.mubr.msk.f32.mxu1 %vm1435_vm2, %v1192_v52 }
 0x1ea   : > { %2360 = vmatmul.mubr.msk.f32.gmra.mxu1 %vm1435_vm2, %v2305_v26 }
 0x1ef   : > { %v1689_v33 = vpop.permute.xlu1 %1688 }
 0x1f0   : > { %vm1727_vm8 = vcmp.eq.s32.totalorder %v1689_v33, %v3357_v32 }
 0x1f7   : > { %v1692_v4 = vpop.permute.xlu1 %1691 }
 0x1f8   : > { %vm1728_vm10 = vcmp.eq.s32.totalorder %v1692_v4, %v3357_v32 }
 0x1fa   : > { %v2308_v31 = vpop.f32.mrf.mxu0 }
 0x1fc   : > { %v1202_v23 = vpop.f32.mrf.mxu0 }
 0x1fd   : > { %2362 = vmatprep.mubr.msk.f32.mxu1 %vm1435_vm2, %v1202_v23 }
 0x1fe   : > { %2363 = vmatmul.mubr.msk.f32.gmra.mxu1 %vm1435_vm2, %v2308_v31 }
 0x203   : > { %v1695_v26 = vpop.permute.xlu1 %1694 }
 0x204   : > { %vm1729_vm11 = vcmp.eq.s32.totalorder %v1695_v26, %v3357_v32 }
 0x20c   : > { %v2311_v55 = vpop.f32.mrf.mxu0 }
 0x20e   : > { %v1212_v29 = vpop.f32.mrf.mxu0 }
 0x20f   : > { %2365 = vmatprep.mubr.msk.f32.mxu1 %vm1435_vm2, %v1212_v29 }
 0x210   : > { %2366 = vmatmul.mubr.msk.f32.gmra.mxu1 %vm1435_vm2, %v2311_v55  ;;  %v1701_v55 = vpop.permute.xlu0 %1700 }
 0x211   : > { %vm1731_vm13 = vcmp.eq.s32.totalorder %v1701_v55, %v3357_v32 }
 0x22e   : > { %v2346_v47 = vpop.f32.mrf.mxu1 }
 0x22f   : > { %v1556_v58 = vadd.f32 %v2346_v47, %v2320_v25 }
 0x230   : > { %v1550_v62 = vpop.f32.mrf.mxu1 }
 0x231   : > { %v1551_v41 = vadd.f32 %v1550_v62, %v1356_v14  ;;  %v1637_v40 = vadd.f32 %v3352_v60, %v1556_v58  ;;  %v1704_v58 = vpop.permute.xlu0 %1703 }
 0x232   : > { %vm1732_vm14 = vcmp.eq.s32.totalorder %v1704_v58, %v3357_v32 }
 0x233   : > { %v1636_v39 = vadd.f32 %v3352_v60, %v1551_v41  ;;  %v1653_v9 = vmax.f32 %v1637_v40, 0.0 }
 0x235   : > { %v1652_v63 = vmax.f32 %v1636_v39, 0.0  ;;  %v1707_v40 = vpop.permute.xlu0 %1706 }
 0x236   : > { %vm1733_vm15 = vcmp.eq.s32.totalorder %v1707_v40, %v3357_v32 }
 0x237   : > { %2400 = vmatprep.mubr.msk.f32.mxu0 %vm1721_vm3, %v1652_v63  ;;  %vm1914_vm3 = vcmask 261120  }
 0x238   : > { %2401 = vmatmul.mubr.msk.f32.vlgmr.msra.gmra.mxu0 %vm1722_vm4, %v1653_v9 }
 0x239   : > { %v1710_v9 = vpop.permute.xlu0 %1709 }
 0x23a   : > { %vm1734_vm0 = vcmp.eq.s32.totalorder %v1710_v9, %v3357_v32 }
 0x25b   : > { %v2349_v34 = vpop.f32.mrf.mxu1 }
 0x25c   : > { %v1566_v35 = vadd.f32 %v2349_v34, %v2323_v22 }
 0x25d   : > { %v1560_v37 = vpop.f32.mrf.mxu1 }
 0x25e   : > { %v1561_v20 = vadd.f32 %v1560_v37, %v1366_v38  ;;  %v1639_v17 = vadd.f32 %v3352_v60, %v1566_v35  ;;  %v1698_v38 = vpop.permute.xlu1 %1697  ;;  %v1713_v35 = vpop.permute.xlu0 %1712 }
 0x25f   : > { %v2352_v8 = vpop.f32.mrf.mxu1  ;;  %vm1730_vm12 = vcmp.eq.s32.totalorder %v1698_v38, %v3357_v32  ;;  %vm1735_vm1 = vcmp.eq.s32.totalorder %v1713_v35, %v3357_v32 }
 0x260   : > { %v1638_v12 = vadd.f32 %v3352_v60, %v1561_v20  ;;  %v1576_v13 = vadd.f32 %v2352_v8, %v2326_v50  ;;  %v1655_v61 = vmax.f32 %v1639_v17, 0.0 }
 0x261   : > { %v1570_v42 = vpop.f32.mrf.mxu1 }
 0x262   : > { %v1654_v15 = vmax.f32 %v1638_v12, 0.0  ;;  %v1571_v18 = vadd.f32 %v1570_v42, %v1376_v53  ;;  %v1641_v7 = vadd.f32 %v3352_v60, %v1576_v13  ;;  %v1716_v8 = vpop.permute.xlu0 %1715 }
 0x263   : > { %vm1736_vm2 = vcmp.eq.s32.totalorder %v1716_v8, %v3357_v32 }
 0x264   : > { %v1640_v2 = vadd.f32 %v3352_v60, %v1571_v18  ;;  %2403 = vmatprep.mubr.msk.f32.mxu0 %vm1723_vm9, %v1654_v15  ;;  %v1657_v56 = vmax.f32 %v1641_v7, 0.0 }
 0x265   : > { %2404 = vmatmul.mubr.msk.f32.gmra.mxu0 %vm1724_vm5, %v1655_v61 }
 0x266   : > { %v1656_v59 = vmax.f32 %v1640_v2, 0.0 }
 0x268   : > { %2406 = vmatprep.mubr.msk.f32.mxu0 %vm1725_vm6, %v1656_v59 }
 0x269   : > { %2407 = vmatmul.mubr.msk.f32.gmra.mxu0 %vm1726_vm7, %v1657_v56 }
 0x272   : > { %v2355_v45 = vpop.f32.mrf.mxu1 }
 0x273   : > { %v1586_v10 = vadd.f32 %v2355_v45, %v2329_v5 }
 0x274   : > { %v1580_v46 = vpop.f32.mrf.mxu1 }
 0x275   : > { %v1581_v28 = vadd.f32 %v1580_v46, %v1386_v54  ;;  %v1643_v3 = vadd.f32 %v3352_v60, %v1586_v10 }
 0x277   : > { %v1642_v49 = vadd.f32 %v3352_v60, %v1581_v28  ;;  %v1659_v51 = vmax.f32 %v1643_v3, 0.0 }
 0x279   : > { %v1658_v0 = vmax.f32 %v1642_v49, 0.0 }
 0x27b   : > { %2409 = vmatprep.mubr.msk.f32.mxu0 %vm1727_vm8, %v1658_v0 }
 0x27c   : > { %2410 = vmatmul.mubr.msk.f32.gmra.mxu0 %vm1728_vm10, %v1659_v51 }
 0x292   : > { %v2358_v52 = vpop.f32.mrf.mxu1 }
 0x293   : > { %v1596_v25 = vadd.f32 %v2358_v52, %v3331_v27 }
 0x294   : > { %v1590_v14 = vpop.f32.mrf.mxu1 }
 0x295   : > { %v1591_v22 = vadd.f32 %v1590_v14, %v3335_v36  ;;  %v1645_v31 = vadd.f32 %v3352_v60, %v1596_v25 }
 0x297   : > { %v1644_v23 = vadd.f32 %v3352_v60, %v1591_v22  ;;  %v1661_v53 = vmax.f32 %v1645_v31, 0.0 }
 0x299   : > { %v1660_v50 = vmax.f32 %v1644_v23, 0.0 }
 0x29b   : > { %2412 = vmatprep.mubr.msk.f32.mxu0 %vm1729_vm11, %v1660_v50 }
 0x29c   : > { %2413 = vmatmul.mubr.msk.f32.gmra.mxu0 %vm1730_vm12, %v1661_v53 }
 0x2aa   : > { %v2361_v5 = vpop.f32.mrf.mxu1 }
 0x2ab   : > { %v1606_v54 = vadd.f32 %v2361_v5, %v3337_v48 }
 0x2ac   : > { %v1600_v29 = vpop.f32.mrf.mxu1 }
 0x2ad   : > { %v1601_v27 = vadd.f32 %v1600_v29, %v3339_v1  ;;  %v1647_v36 = vadd.f32 %v3352_v60, %v1606_v54 }
 0x2af   : > { %v1646_v47 = vadd.f32 %v3352_v60, %v1601_v27  ;;  %v1663_v41 = vmax.f32 %v1647_v36, 0.0 }
 0x2b1   : > { %v1662_v62 = vmax.f32 %v1646_v47, 0.0 }
 0x2b3   : > { %2415 = vmatprep.mubr.msk.f32.mxu1 %vm1731_vm13, %v1662_v62 }
 0x2b4   : > { %2416 = vmatmul.mubr.msk.f32.vlgmr.msra.gmra.mxu1 %vm1732_vm14, %v1663_v41 }
 0x2be   : > { %v2364_v19 = vpop.f32.mrf.mxu1 }
 0x2bf   : > { %v1616_v48 = vadd.f32 %v2364_v19, %v3341_v44 }
 0x2c0   : > { %v1610_v16 = vpop.f32.mrf.mxu1 }
 0x2c1   : > { %v1611_v1 = vadd.f32 %v1610_v16, %v3343_v43  ;;  %v1649_v39 = vadd.f32 %v3352_v60, %v1616_v48 }
 0x2c3   : > { %v1648_v63 = vadd.f32 %v3352_v60, %v1611_v1  ;;  %v1665_v34 = vmax.f32 %v1649_v39, 0.0 }
 0x2c5   : > { %v1664_v6 = vmax.f32 %v1648_v63, 0.0 }
 0x2c7   : > { %2418 = vmatprep.mubr.msk.f32.mxu1 %vm1733_vm15, %v1664_v6 }
 0x2c8   : > { %2419 = vmatmul.mubr.msk.f32.gmra.mxu1 %vm1734_vm0, %v1665_v34 }
 0x2d0   : > { %v2367_v44 = vpop.f32.mrf.mxu1 }
 0x2d1   : > { %v1626_v37 = vadd.f32 %v2367_v44, %v3345_v57 }
 0x2d2   : > { %v1620_v21 = vpop.f32.mrf.mxu1 }
 0x2d3   : > { %v1621_v43 = vadd.f32 %v1620_v21, %v3347_v30  ;;  %v1651_v20 = vadd.f32 %v3352_v60, %v1626_v37 }
 0x2d5   : > { %v1650_v17 = vadd.f32 %v3352_v60, %v1621_v43  ;;  %v1667_v12 = vmax.f32 %v1651_v20, 0.0 }
 0x2d7   : > { %v1666_v11 = vmax.f32 %v1650_v17, 0.0 }
 0x2d9   : > { %2421 = vmatprep.mubr.msk.f32.mxu1 %vm1735_vm1, %v1666_v11 }
 0x2da   : > { %2422 = vmatmul.mubr.msk.f32.gmra.mxu1 %vm1736_vm2, %v1667_v12 }
 0x2f8   : > { %v2402_v57 = vpop.f32.mrf.mxu0 }
 0x2f9   : > { %1916 = vst.msk [vmem:[%s3403_s28 + $0x8] sm:$0xff] %vm1914_vm3, %v2402_v57 }
 0x2fa   : > { %v1835_v30 = vpop.f32.mrf.mxu0 }
 0x2fb   : > { %1915 = vst.msk [vmem:[%s3403_s28] sm:$0xff] %vm1914_vm3, %v1835_v30 }
 0x325   : > { %v2405_v60 = vpop.f32.mrf.mxu0 }
 0x326   : > { %1918 = vst.msk [vmem:[%s3403_s28 + $0x18] sm:$0xff] %vm1914_vm3, %v2405_v60 }
 0x327   : > { %v1845_v32 = vpop.f32.mrf.mxu0 }
 0x328   : > { %1917 = vst.msk [vmem:[%s3403_s28 + $0x10] sm:$0xff] %vm1914_vm3, %v1845_v32 }
 0x329   : > { %v2408_v13 = vpop.f32.mrf.mxu0 }
 0x32a   : > { %1920 = vst.msk [vmem:[%s3403_s28 + $0x28] sm:$0xff] %vm1914_vm3, %v2408_v13 }
 0x32b   : > { %v1855_v42 = vpop.f32.mrf.mxu0 }
 0x32c   : > { %1919 = vst.msk [vmem:[%s3403_s28 + $0x20] sm:$0xff] %vm1914_vm3, %v1855_v42 }
 0x33c   : > { %v2411_v15 = vpop.f32.mrf.mxu0 }
 0x33d   : > { %1922 = vst.msk [vmem:[%s3403_s28 + $0x38] sm:$0xff] %vm1914_vm3, %v2411_v15 }
 0x33e   : > { %v1865_v18 = vpop.f32.mrf.mxu0 }
 0x33f   : > { %1921 = vst.msk [vmem:[%s3403_s28 + $0x30] sm:$0xff] %vm1914_vm3, %v1865_v18 }
 0x35c   : > { %v2414_v61 = vpop.f32.mrf.mxu0 }
 0x35d   : > { %1924 = vst.msk [vmem:[%s3403_s28 + $0x48] sm:$0xff] %vm1914_vm3, %v2414_v61 }
 0x35e   : > { %v1875_v7 = vpop.f32.mrf.mxu0 }
 0x35f   : > { %1923 = vst.msk [vmem:[%s3403_s28 + $0x40] sm:$0xff] %vm1914_vm3, %v1875_v7 }
 0x374   : > { %v2417_v24 = vpop.f32.mrf.mxu1 }
 0x375   : > { %1926 = vst.msk [vmem:[%s3403_s28 + $0x58] sm:$0xff] %vm1914_vm3, %v2417_v24 }
 0x376   : > { %v1885_v2 = vpop.f32.mrf.mxu1 }
 0x377   : > { %1925 = vst.msk [vmem:[%s3403_s28 + $0x50] sm:$0xff] %vm1914_vm3, %v1885_v2 }
 0x388   : > { %v2420_v59 = vpop.f32.mrf.mxu1 }
 0x389   : > { %1928 = vst.msk [vmem:[%s3403_s28 + $0x68] sm:$0xff] %vm1914_vm3, %v2420_v59 }
 0x38a   : > { %v1895_v56 = vpop.f32.mrf.mxu1 }
 0x38b   : > { %1927 = vst.msk [vmem:[%s3403_s28 + $0x60] sm:$0xff] %vm1914_vm3, %v1895_v56 }
 0x39a   : > { %v2423_v33 = vpop.f32.mrf.mxu1 }
 0x39b   : > { %1930 = vst.msk [vmem:[%s3403_s28 + $0x78] sm:$0xff] %vm1914_vm3, %v2423_v33 }
 0x39c   : > { %v1905_v45 = vpop.f32.mrf.mxu1 }
 0x39d   : > { %1929 = vst.msk [vmem:[%s3403_s28 + $0x70] sm:$0xff] %vm1914_vm3, %v1905_v45 }
 0x39e PF: > { %s18_s27 = sadd.s32 1, %s2515_s27  }
 0x39f   : > { %p15_p4 = scmp.ge.s32.totalorder %s18_s27, 4  }
 0x3a1   :  { %17 = sbr.rel (!%p15_p4) target bundleno = 1 (0x1), region = 88 }

</bundles_post_ra>
